<compile_context>
chip_gen: v7x
topology: tpu7x:2x2x1
jax: 0.10.0
libtpu: 0.0.40
codegen_flags: <defaults>
</compile_context>

<pallas_src>
import functools

import numpy as np
import jax
import jax.numpy as jnp
from jax import lax
from jax.experimental import pallas as pl
from jax.experimental.pallas import tpu as pltpu

K = 10                      # conv kernel size
S = 2                       # conv stride
C_IN = 3
H = W = 32
OH = OW = (H - K) // S + 1  # 12
NPATCH = OH * OW            # 144  (matches x.view(-1, 144))
NPIX = C_IN * H * W         # 3072 (flattened raw image)
NCLASS = 10
NCLASS_PAD = 128            # pad class dim to a full lane tile (unmasked stores)
TB_DEFAULT = 32             # batch tile (samples per grid step)
CONV_DTYPE = jnp.bfloat16   # conv-matmul operand dtype (jnp.float32 = exact, ~3x more MXU passes)


def _cnn_kernel(x_ref, g_ref, cb_ref, fcw_ref, fcb_ref, o_ref):
    """One grid step == TB samples.

    x_ref   : (TB, 3072)   raw NCHW images, flattened, f32
    g_ref   : (3072, 144)  conv operator matrix (bf16), resident across steps
    cb_ref  : (1, 1)       conv bias scalar (SMEM)
    fcw_ref : (144, 128)   fc_w.T zero-padded to 128 classes, f32, resident
    fcb_ref : (1, 128)     fc bias zero-padded, f32, resident
    o_ref   : (TB, 128)    logits (columns >= 10 are zero)
    """
    x = x_ref[...].astype(g_ref.dtype)                                   # (TB, 3072)
    conv = jnp.dot(x, g_ref[...], preferred_element_type=jnp.float32)    # (TB, 144)
    act = jnp.maximum(conv + cb_ref[0, 0], 0.0)                          # bias + ReLU
    o_ref[...] = jnp.dot(act, fcw_ref[...],
                         preferred_element_type=jnp.float32) + fcb_ref[...]


def _conv_operator(conv_w, dtype):
    """Fold the 10x10x3 stride-2 conv into a dense (3072, 144) matrix G so that
    (x.reshape(B, 3072) @ G)[b, i*12+j] == conv2d(x, conv_w)[b, 0, i, j]."""
    w = conv_w.reshape(C_IN, K, K).astype(jnp.float32)                   # (3, 10, 10)
    t = jnp.arange(H)[:, None] - S * jnp.arange(OH)[None, :]             # (32, 12) tap index
    valid = (t >= 0) & (t < K)
    tc = jnp.clip(t, 0, K - 1)
    # g5[c, r, i, wcol, j] = w[c, r - 2i, wcol - 2j] (0 where out of the window)
    g5 = w[:, tc[:, :, None, None], tc[None, None, :, :]]                # (3, 32, 12, 32, 12)
    g5 = jnp.where(valid[:, :, None, None] & valid[None, None, :, :], g5, 0.0)
    g = g5.transpose(0, 1, 3, 2, 4).reshape(NPIX, NPATCH)                # rows (c,r,w), cols (i,j)
    return g.astype(dtype)


def _round_up(n, m):
    return ((n + m - 1) // m) * m


@functools.partial(jax.jit, static_argnames=("tb",))
def simple_cnn_one_filter(x, conv_w, conv_b, fc_w, fc_b, *, tb=TB_DEFAULT):
    """Forward pass matching the PyTorch module.

    x      : (B, 3, 32, 32) float32, NCHW
    conv_w : (1, 3, 10, 10) float32 (OIHW)
    conv_b : (1,)  float32
    fc_w   : (10, 144) float32 (PyTorch Linear weight)
    fc_b   : (10,) float32
    returns: (B, 10) float32 logits
    """
    B = x.shape[0]
    tb = max(8, min(int(tb), _round_up(B, 8)))   # don't over-pad tiny batches
    b_pad = _round_up(B, tb)
    num_tiles = b_pad // tb                      # (v7x: >=2 tiles keeps both TCs busy)

    x_flat = x.astype(jnp.float32).reshape(B, NPIX)          # free view of NCHW
    if b_pad != B:
        x_flat = jnp.pad(x_flat, ((0, b_pad - B), (0, 0)))

    g = _conv_operator(conv_w, CONV_DTYPE)                               # (3072, 144)
    cb = conv_b.reshape(1, 1).astype(jnp.float32)                        # SMEM scalar
    fcw_pad = jnp.zeros((NPATCH, NCLASS_PAD), jnp.float32)
    fcw_pad = fcw_pad.at[:, :NCLASS].set(fc_w.T.astype(jnp.float32))     # (144, 128)
    fcb_pad = jnp.zeros((1, NCLASS_PAD), jnp.float32)
    fcb_pad = fcb_pad.at[0, :NCLASS].set(fc_b.astype(jnp.float32))       # (1, 128)

    out = pl.pallas_call(
        _cnn_kernel,
        out_shape=jax.ShapeDtypeStruct((b_pad, NCLASS_PAD), jnp.float32),
        grid=(num_tiles,),
        in_specs=[
            pl.BlockSpec((tb, NPIX), lambda t: (t, 0)),                  # raw image stream
            pl.BlockSpec((NPIX, NPATCH), lambda t: (0, 0)),              # G, resident
            pl.BlockSpec(memory_space=pltpu.MemorySpace.SMEM),           # conv bias scalar
            pl.BlockSpec((NPATCH, NCLASS_PAD), lambda t: (0, 0)),        # fc weight, resident
            pl.BlockSpec((1, NCLASS_PAD), lambda t: (0, 0)),             # fc bias, resident
        ],
        out_specs=pl.BlockSpec((tb, NCLASS_PAD), lambda t: (t, 0)),
        compiler_params=pltpu.CompilerParams(
            dimension_semantics=("parallel",)),
    )(x_flat, g, cb, fcw_pad, fcb_pad)

    return out[:B, :NCLASS]


def _reference(x, conv_w, conv_b, fc_w, fc_b):
    """Pure-JAX f32 reference mirroring the PyTorch forward."""
    conv = lax.conv_general_dilated(
        x.astype(jnp.float32), conv_w.astype(jnp.float32),
        window_strides=(S, S), padding="VALID",
        dimension_numbers=("NCHW", "OIHW", "NCHW"),
        precision=lax.Precision.HIGHEST)
    act = jnp.maximum(conv + conv_b.reshape(1, 1, 1, 1), 0.0)
    flat = act.reshape(-1, NPATCH)
    return jnp.dot(flat, fc_w.T, precision=lax.Precision.HIGHEST) + fc_b


if __name__ == "__main__":
    key = jax.random.PRNGKey(0)
    kx, kw1, kb1, kw2, kb2 = jax.random.split(key, 5)

    B = 2
    x = jax.random.normal(kx, (B, C_IN, H, W), jnp.float32)

    # Deterministic parameter init (shapes match the PyTorch module's __init__).
    conv_w = 0.1 * jax.random.normal(kw1, (1, C_IN, K, K), jnp.float32)
    conv_b = 0.1 * jax.random.normal(kb1, (1,), jnp.float32)
    fc_w = 0.1 * jax.random.normal(kw2, (NCLASS, NPATCH), jnp.float32)
    fc_b = 0.1 * jax.random.normal(kb2, (NCLASS,), jnp.float32)

    out = jax.block_until_ready(simple_cnn_one_filter(x, conv_w, conv_b, fc_w, fc_b))
    ref = jax.block_until_ready(_reference(x, conv_w, conv_b, fc_w, fc_b))

    # Conv matmul runs with bf16 operands (f32 accumulation); bf16 rounding of
    # x / conv_w bounds the logit error well below this tolerance at these scales.
    np.testing.assert_allclose(np.asarray(out), np.asarray(ref), rtol=5e-2, atol=5e-2)

    print("KERNEL_OK")
</pallas_src>

<mosaic_0001>
module attributes {stable_mosaic.version = 11 : i64} {
  func.func @_cnn_kernel(%arg0: i32, %arg1: memref<8x3072xf32, #tpu.memory_space<vmem>>, %arg2: memref<3072x144xbf16, #tpu.memory_space<vmem>>, %arg3: memref<1x1xf32, #tpu.memory_space<smem>>, %arg4: memref<144x128xf32, #tpu.memory_space<vmem>>, %arg5: memref<1x128xf32, #tpu.memory_space<vmem>>, %arg6: memref<8x128xf32, #tpu.memory_space<vmem>>) attributes {dimension_semantics = [#tpu.dimension_semantics<parallel>], iteration_bounds = array<i64: 1>, scalar_prefetch = 0 : i64, scratch_operands = 0 : i64, tpu.core_type = #tpu.core_type<tc>, window_params = [{transform_indices = @transform_0, window_bounds = array<i64: 8, 3072>}, {pipeline_mode = #tpu.pipeline_mode<synchronous>, transform_indices = @transform_1, window_bounds = array<i64: 3072, 144>}, {transform_indices = @transform_2, window_bounds = array<i64: 1, 1>}, {pipeline_mode = #tpu.pipeline_mode<synchronous>, transform_indices = @transform_3, window_bounds = array<i64: 144, 128>}, {pipeline_mode = #tpu.pipeline_mode<synchronous>, transform_indices = @transform_4, window_bounds = array<i64: 1, 128>}, {transform_indices = @transform_5, window_bounds = array<i64: 8, 128>}]} {
    %c0 = arith.constant 0 : index
    %c0_0 = arith.constant 0 : index
    %0 = vector.load %arg1[%c0, %c0_0] : memref<8x3072xf32, #tpu.memory_space<vmem>>, vector<8x3072xf32>
    %1 = arith.truncf %0 : vector<8x3072xf32> to vector<8x3072xbf16>
    %c0_1 = arith.constant 0 : index
    %c0_2 = arith.constant 0 : index
    %2 = vector.load %arg2[%c0_1, %c0_2] : memref<3072x144xbf16, #tpu.memory_space<vmem>>, vector<3072x144xbf16>
    %cst = arith.constant dense<0.000000e+00> : vector<8x144xf32>
    %3 = tpu.matmul %1, %2, %cst {dimension_numbers = #tpu.dot_dimension_numbers<[1], [0], [0], [1], [0, 0, 1, 1], [], []>} : vector<8x3072xbf16>, vector<3072x144xbf16>, vector<8x144xf32> -> vector<8x144xf32>
    %c0_3 = arith.constant 0 : index
    %c0_4 = arith.constant 0 : index
    %4 = memref.load %arg3[%c0_3, %c0_4] : memref<1x1xf32, #tpu.memory_space<smem>>
    %5 = vector.broadcast %4 : f32 to vector<8x144xf32>
    %6 = arith.addf %3, %5 : vector<8x144xf32>
    %cst_5 = arith.constant 0.000000e+00 : f32
    %7 = vector.broadcast %cst_5 : f32 to vector<8x144xf32>
    %8 = arith.maximumf %6, %7 : vector<8x144xf32>
    %c0_6 = arith.constant 0 : index
    %c0_7 = arith.constant 0 : index
    %9 = vector.load %arg4[%c0_6, %c0_7] : memref<144x128xf32, #tpu.memory_space<vmem>>, vector<144x128xf32>
    %cst_8 = arith.constant dense<0.000000e+00> : vector<8x128xf32>
    %10 = tpu.matmul %8, %9, %cst_8 {dimension_numbers = #tpu.dot_dimension_numbers<[1], [0], [0], [1], [0, 0, 1, 1], [], []>} : vector<8x144xf32>, vector<144x128xf32>, vector<8x128xf32> -> vector<8x128xf32>
    %c0_9 = arith.constant 0 : index
    %c0_10 = arith.constant 0 : index
    %11 = vector.load %arg5[%c0_9, %c0_10] : memref<1x128xf32, #tpu.memory_space<vmem>>, vector<1x128xf32>
    %12 = vector.broadcast %11 : vector<1x128xf32> to vector<8x128xf32>
    %13 = arith.addf %10, %12 : vector<8x128xf32>
    %c0_11 = arith.constant 0 : index
    %c0_12 = arith.constant 0 : index
    %14 = vector.load %arg6[%c0_11, %c0_12] : memref<8x128xf32, #tpu.memory_space<vmem>>, vector<8x128xf32>
    tpu.vector_store %arg6[%c0_11, %c0_12], %13 {strides = array<i32>} : memref<8x128xf32, #tpu.memory_space<vmem>>, vector<8x128xf32>,
    return
  }
  func.func @transform_0(%arg0: i32) -> (i32, i32) {
    %c0_i32 = arith.constant 0 : i32
    %c0_i32_0 = arith.constant 0 : i32
    return %arg0, %c0_i32 : i32, i32
  }
  func.func @transform_1(%arg0: i32) -> (i32, i32) {
    %c0_i32 = arith.constant 0 : i32
    %c0_i32_0 = arith.constant 0 : i32
    %c0_i32_1 = arith.constant 0 : i32
    return %c0_i32, %c0_i32_0 : i32, i32
  }
  func.func @transform_2(%arg0: i32) -> (i32, i32) {
    %c0_i32 = arith.constant 0 : i32
    %c0_i32_0 = arith.constant 0 : i32
    %c0_i32_1 = arith.constant 0 : i32
    return %c0_i32, %c0_i32_0 : i32, i32
  }
  func.func @transform_3(%arg0: i32) -> (i32, i32) {
    %c0_i32 = arith.constant 0 : i32
    %c0_i32_0 = arith.constant 0 : i32
    %c0_i32_1 = arith.constant 0 : i32
    return %c0_i32, %c0_i32_0 : i32, i32
  }
  func.func @transform_4(%arg0: i32) -> (i32, i32) {
    %c0_i32 = arith.constant 0 : i32
    %c0_i32_0 = arith.constant 0 : i32
    %c0_i32_1 = arith.constant 0 : i32
    return %c0_i32, %c0_i32_0 : i32, i32
  }
  func.func @transform_5(%arg0: i32) -> (i32, i32) {
    %c0_i32 = arith.constant 0 : i32
    %c0_i32_0 = arith.constant 0 : i32
    return %arg0, %c0_i32 : i32, i32
  }
}

</mosaic_0001>

<bundles_post_ra>
// kernel: simple_cnn_one_filter.1
= control target key start
LH: loop header
LB: loop body
LE: loop exit
PB: predicated region body
PF: predicated region fallthrough
CT: control target
= control target key end

     0   :  { %vm2894_vm0 = vcmask 130048   ;;  %s5325_s1 = inlined_call_operand.vmem [shape: bf16[3072,144], index: 1, kind: input, shape index: {}]   ;;  %s5326_s0 = inlined_call_operand.vmem [shape: f32[8,3072], index: 0, kind: input, shape index: {}]   ;;  %s5327_s3 = inlined_call_operand.vmem [shape: f32[144,128], index: 3, kind: input, shape index: {}]   ;;  %s5328_s2 = inlined_call_operand.<no memory space> [shape: f32[1,1], index: 2, kind: input, shape index: {}]   ;;  %s5329_s4 = inlined_call_operand.vmem [shape: f32[1,128], index: 4, kind: input, shape index: {}]   ;;  %s5330_s5 = inlined_call_operand.vmem [shape: f32[8,128], index: 5, kind: output, shape index: {}]  }
   0x1   :  { %v3431_v0 = vld [vmem:[%s5325_s1 + $0x4] ss:$8 sps:$4 sm:$0xff]   ;;  %v3435_v2 = vld [vmem:[%s5325_s1] ss:$8 sps:$4 sm:$0xff]   ;;  %v3437_v4 = vld [vmem:[%s5325_s1 + $0x14] ss:$8 sps:$4 sm:$0xff]  }
   0x2   :  { %v3433_v1 = vld [vmem:[%s5325_s1 + $0x604] ss:$8 sps:$4 sm:$0xff]   ;;  %2375 = vmatprep.subr.bf16.mxu1 %v3431_v0  ;;  %v3436_v3 = vld [vmem:[%s5325_s1 + $0x600] ss:$8 sps:$4 sm:$0xff]   ;;  %v3439_v5 = vld [vmem:[%s5325_s1 + $0x614] ss:$8 sps:$4 sm:$0xff]  }
   0x3   :  { %2621 = vmatprep.subr.bf16.mxu0 %v3433_v1  ;;  %2376 = vmatpush1.bf16.msra.mxu1 %v3435_v2  ;;  %v3441_v6 = vld [vmem:[%s5325_s1 + $0x10] ss:$8 sps:$4 sm:$0xff]   ;;  %v3443_v8 = vld [vmem:[%s5325_s1 + $0x24] ss:$8 sps:$4 sm:$0xff]   ;;  %v3447_v10 = vld [vmem:[%s5325_s1 + $0x20] ss:$8 sps:$4 sm:$0xff]  }
   0x4   :  { %2622 = vmatpush1.bf16.msra.mxu0 %v3436_v3  ;;  %2377 = vmatprep.subr.bf16.mxu1 %v3437_v4  ;;  %v3442_v7 = vld [vmem:[%s5325_s1 + $0x610] ss:$8 sps:$4 sm:$0xff]   ;;  %v3445_v9 = vld [vmem:[%s5325_s1 + $0x624] ss:$8 sps:$4 sm:$0xff]   ;;  %v3448_v11 = vld [vmem:[%s5325_s1 + $0x620] ss:$8 sps:$4 sm:$0xff]  }
   0x5   :  { %2623 = vmatprep.subr.bf16.mxu0 %v3439_v5  ;;  %v3449_v12 = vld [vmem:[%s5325_s1 + $0x34] ss:$8 sps:$4 sm:$0xff]   ;;  %v3453_v14 = vld [vmem:[%s5325_s1 + $0x30] ss:$8 sps:$4 sm:$0xff]   ;;  %v3455_v16 = vld [vmem:[%s5325_s1 + $0x44] ss:$8 sps:$4 sm:$0xff]  }
   0x6   :  { %v3451_v13 = vld [vmem:[%s5325_s1 + $0x634] ss:$8 sps:$4 sm:$0xff]   ;;  %v3454_v15 = vld [vmem:[%s5325_s1 + $0x630] ss:$8 sps:$4 sm:$0xff]   ;;  %v3457_v17 = vld [vmem:[%s5325_s1 + $0x644] ss:$8 sps:$4 sm:$0xff]  }
   0x7   :  { %2378 = vmatpush1.bf16.msra.mxu1 %v3441_v6  ;;  %v3459_v18 = vld [vmem:[%s5325_s1 + $0x40] ss:$8 sps:$4 sm:$0xff]   ;;  %v3461_v20 = vld [vmem:[%s5325_s1 + $0x54] ss:$8 sps:$4 sm:$0xff]   ;;  %v3465_v22 = vld [vmem:[%s5325_s1 + $0x50] ss:$8 sps:$4 sm:$0xff]  }
   0x8   :  { %2624 = vmatpush1.bf16.msra.mxu0 %v3442_v7  ;;  %2379 = vmatprep.subr.bf16.mxu1 %v3443_v8  ;;  %v3460_v19 = vld [vmem:[%s5325_s1 + $0x640] ss:$8 sps:$4 sm:$0xff]   ;;  %v3463_v21 = vld [vmem:[%s5325_s1 + $0x654] ss:$8 sps:$4 sm:$0xff]   ;;  %v3466_v23 = vld [vmem:[%s5325_s1 + $0x650] ss:$8 sps:$4 sm:$0xff]  }
   0x9   :  { %2625 = vmatprep.subr.bf16.mxu0 %v3445_v9  ;;  %v3467_v24 = vld [vmem:[%s5325_s1 + $0x64] ss:$8 sps:$4 sm:$0xff]   ;;  %v3471_v26 = vld [vmem:[%s5325_s1 + $0x60] ss:$8 sps:$4 sm:$0xff]   ;;  %v3473_v28 = vld [vmem:[%s5325_s1 + $0x74] ss:$8 sps:$4 sm:$0xff]  }
   0xa   :  { %v3469_v25 = vld [vmem:[%s5325_s1 + $0x664] ss:$8 sps:$4 sm:$0xff]   ;;  %v3472_v27 = vld [vmem:[%s5325_s1 + $0x660] ss:$8 sps:$4 sm:$0xff]   ;;  %v3475_v29 = vld [vmem:[%s5325_s1 + $0x674] ss:$8 sps:$4 sm:$0xff]  }
   0xb   :  { %2380 = vmatpush1.bf16.msra.mxu1 %v3447_v10  ;;  %v3477_v30 = vld [vmem:[%s5325_s1 + $0x70] ss:$8 sps:$4 sm:$0xff]   ;;  %v3479_v32 = vld [vmem:[%s5325_s1 + $0x84] ss:$8 sps:$4 sm:$0xff]   ;;  %v3483_v34 = vld [vmem:[%s5325_s1 + $0x80] ss:$8 sps:$4 sm:$0xff]  }
   0xc   :  { %2626 = vmatpush1.bf16.msra.mxu0 %v3448_v11  ;;  %2381 = vmatprep.subr.bf16.mxu1 %v3449_v12  ;;  %v3478_v31 = vld [vmem:[%s5325_s1 + $0x670] ss:$8 sps:$4 sm:$0xff]   ;;  %v3481_v33 = vld [vmem:[%s5325_s1 + $0x684] ss:$8 sps:$4 sm:$0xff]   ;;  %v3484_v35 = vld [vmem:[%s5325_s1 + $0x680] ss:$8 sps:$4 sm:$0xff]  }
   0xd   :  { %2627 = vmatprep.subr.bf16.mxu0 %v3451_v13  ;;  %v3485_v36 = vld [vmem:[%s5325_s1 + $0x94] ss:$8 sps:$4 sm:$0xff]   ;;  %v3489_v38 = vld [vmem:[%s5325_s1 + $0x90] ss:$8 sps:$4 sm:$0xff]   ;;  %v3491_v40 = vld [vmem:[%s5325_s1 + $0xa4] ss:$8 sps:$4 sm:$0xff]  }
   0xe   :  { %v3487_v37 = vld [vmem:[%s5325_s1 + $0x694] ss:$8 sps:$4 sm:$0xff]   ;;  %v3490_v39 = vld [vmem:[%s5325_s1 + $0x690] ss:$8 sps:$4 sm:$0xff]   ;;  %v3493_v41 = vld [vmem:[%s5325_s1 + $0x6a4] ss:$8 sps:$4 sm:$0xff]  }
   0xf   :  { %2382 = vmatpush1.bf16.msra.mxu1 %v3453_v14  ;;  %v3495_v42 = vld [vmem:[%s5325_s1 + $0xa0] ss:$8 sps:$4 sm:$0xff]   ;;  %v3497_v44 = vld [vmem:[%s5325_s1 + $0xb4] ss:$8 sps:$4 sm:$0xff]   ;;  %v3501_v47 = vld [vmem:[%s5325_s1 + $0xb0] ss:$8 sps:$4 sm:$0xff]  }
  0x10   :  { %2628 = vmatpush1.bf16.msra.mxu0 %v3454_v15  ;;  %2383 = vmatprep.subr.bf16.mxu1 %v3455_v16  ;;  %v3496_v43 = vld [vmem:[%s5325_s1 + $0x6a0] ss:$8 sps:$4 sm:$0xff]   ;;  %v3499_v45 = vld [vmem:[%s5325_s1 + $0x6b4] ss:$8 sps:$4 sm:$0xff]   ;;  %v3502_v49 = vld [vmem:[%s5325_s1 + $0x6b0] ss:$8 sps:$4 sm:$0xff]  }
  0x11   :  { %2629 = vmatprep.subr.bf16.mxu0 %v3457_v17  ;;  %v22_v46 = vld [vmem:[%s5326_s0 + $0x8] sm:$0xff]  ;;  %v3509_v56 = vld [vmem:[%s5325_s1 + $0xd4] ss:$8 sps:$4 sm:$0xff]   ;;  %v3513_v58 = vld [vmem:[%s5325_s1 + $0xd0] ss:$8 sps:$4 sm:$0xff]  }
  0x12   :  { %v46_v48 = vpack.c.bf16 %v22_v46, %v22_v46  ;;  %v34_v50 = vld [vmem:[%s5326_s0 + $0x68] sm:$0xff]  ;;  %v3511_v57 = vld [vmem:[%s5325_s1 + $0x6d4] ss:$8 sps:$4 sm:$0xff]   ;;  %v3514_v59 = vld [vmem:[%s5325_s1 + $0x6d0] ss:$8 sps:$4 sm:$0xff]  }
  0x13   :  { %2384 = vmatpush1.bf16.msra.mxu1 %v3459_v18  ;;  %v3503_v51 = vld [vmem:[%s5325_s1 + $0xc4] ss:$8 sps:$4 sm:$0xff]   ;;  %v58_v53 = vpack.c.bf16 %v34_v50, %v34_v50  ;;  %v3507_v54 = vld [vmem:[%s5325_s1 + $0xc0] ss:$8 sps:$4 sm:$0xff]   ;;  %v3521_v0 = vld [vmem:[%s5325_s1 + $0xf4] ss:$8 sps:$4 sm:$0xff]  }
  0x14   :  { %2630 = vmatpush1.bf16.msra.mxu0 %v3460_v19  ;;  %2385 = vmatprep.subr.bf16.mxu1 %v3461_v20  ;;  %v3505_v52 = vld [vmem:[%s5325_s1 + $0x6c4] ss:$8 sps:$4 sm:$0xff]   ;;  %v3508_v55 = vld [vmem:[%s5325_s1 + $0x6c0] ss:$8 sps:$4 sm:$0xff]   ;;  %v3523_v1 = vld [vmem:[%s5325_s1 + $0x6f4] ss:$8 sps:$4 sm:$0xff]  }
  0x15   :  { %2631 = vmatprep.subr.bf16.mxu0 %v3463_v21  ;;  %2407 = vmatprep.mubr.bf16.mxu1 %v46_v48  ;;  %v3515_v60 = vld [vmem:[%s5325_s1 + $0xe4] ss:$8 sps:$4 sm:$0xff]   ;;  %v3519_v62 = vld [vmem:[%s5325_s1 + $0xe0] ss:$8 sps:$4 sm:$0xff]   ;;  %v3525_v2 = vld [vmem:[%s5325_s1 + $0xf0] ss:$8 sps:$4 sm:$0xff]  }
  0x16   :  { %2653 = vmatprep.mubr.bf16.mxu0 %v58_v53  ;;  %v3517_v61 = vld [vmem:[%s5325_s1 + $0x6e4] ss:$8 sps:$4 sm:$0xff]   ;;  %v3520_v63 = vld [vmem:[%s5325_s1 + $0x6e0] ss:$8 sps:$4 sm:$0xff]   ;;  %v3526_v3 = vld [vmem:[%s5325_s1 + $0x6f0] ss:$8 sps:$4 sm:$0xff]  }
  0x17   :  { %2386 = vmatpush1.bf16.msra.mxu1 %v3465_v22  ;;  %v3529_v4 = vld [vmem:[%s5325_s1 + $0x104] ss:$8 sps:$4 sm:$0xff]   ;;  %v3527_v8 = vld [vmem:[%s5325_s1 + $0x100] ss:$8 sps:$4 sm:$0xff]   ;;  %v3535_v12 = vld [vmem:[%s5325_s1 + $0x114] ss:$8 sps:$4 sm:$0xff]  }
  0x18   :  { %2632 = vmatpush1.bf16.msra.mxu0 %v3466_v23  ;;  %2387 = vmatprep.subr.bf16.mxu1 %v3467_v24  ;;  %v21_v5 = vld [vmem:[%s5326_s0] sm:$0xff]  ;;  %v3538_v13 = vld [vmem:[%s5325_s1 + $0x714] ss:$8 sps:$4 sm:$0xff]   ;;  %v3533_v14 = vld [vmem:[%s5325_s1 + $0x110] ss:$8 sps:$4 sm:$0xff]  }
  0x19   :  { %2633 = vmatprep.subr.bf16.mxu0 %v3469_v25  ;;  %v33_v6 = vld [vmem:[%s5326_s0 + $0x60] sm:$0xff]  ;;  %v45_v10 = vpack.c.bf16 %v21_v5, %v21_v5  ;;  %v3536_v15 = vld [vmem:[%s5325_s1 + $0x710] ss:$8 sps:$4 sm:$0xff]   ;;  %v3547_v20 = vld [vmem:[%s5325_s1 + $0x134] ss:$8 sps:$4 sm:$0xff]  }
  0x1a   :  { %v3532_v7 = vld [vmem:[%s5325_s1 + $0x704] ss:$8 sps:$4 sm:$0xff]   ;;  %v3530_v9 = vld [vmem:[%s5325_s1 + $0x700] ss:$8 sps:$4 sm:$0xff]   ;;  %v57_v11 = vpack.c.bf16 %v33_v6, %v33_v6  ;;  %v3550_v21 = vld [vmem:[%s5325_s1 + $0x734] ss:$8 sps:$4 sm:$0xff]  }
  0x1b   :  { %2388 = vmatpush1.bf16.msra.mxu1 %v3471_v26  ;;  %v3541_v16 = vld [vmem:[%s5325_s1 + $0x124] ss:$8 sps:$4 sm:$0xff]   ;;  %v3539_v18 = vld [vmem:[%s5325_s1 + $0x120] ss:$8 sps:$4 sm:$0xff]   ;;  %v3545_v22 = vld [vmem:[%s5325_s1 + $0x130] ss:$8 sps:$4 sm:$0xff]  }
  0x1c   :  { %2634 = vmatpush1.bf16.msra.mxu0 %v3472_v27  ;;  %2389 = vmatprep.subr.bf16.mxu1 %v3473_v28  ;;  %v3544_v17 = vld [vmem:[%s5325_s1 + $0x724] ss:$8 sps:$4 sm:$0xff]   ;;  %v3542_v19 = vld [vmem:[%s5325_s1 + $0x720] ss:$8 sps:$4 sm:$0xff]   ;;  %v3548_v23 = vld [vmem:[%s5325_s1 + $0x730] ss:$8 sps:$4 sm:$0xff]  }
  0x1d   :  { %2635 = vmatprep.subr.bf16.mxu0 %v3475_v29  ;;  %v3553_v24 = vld [vmem:[%s5325_s1 + $0x144] ss:$8 sps:$4 sm:$0xff]   ;;  %v3551_v26 = vld [vmem:[%s5325_s1 + $0x140] ss:$8 sps:$4 sm:$0xff]   ;;  %v3559_v28 = vld [vmem:[%s5325_s1 + $0x154] ss:$8 sps:$4 sm:$0xff]  }
  0x1e   :  { %v3556_v25 = vld [vmem:[%s5325_s1 + $0x744] ss:$8 sps:$4 sm:$0xff]   ;;  %v3554_v27 = vld [vmem:[%s5325_s1 + $0x740] ss:$8 sps:$4 sm:$0xff]   ;;  %v3562_v29 = vld [vmem:[%s5325_s1 + $0x754] ss:$8 sps:$4 sm:$0xff]  }
  0x1f   :  { %2390 = vmatpush1.bf16.msra.mxu1 %v3477_v30  ;;  %v3557_v30 = vld [vmem:[%s5325_s1 + $0x150] ss:$8 sps:$4 sm:$0xff]   ;;  %v3575_v46 = vld [vmem:[%s5325_s1 + $0x180] ss:$8 sps:$4 sm:$0xff]   ;;  %v3583_v48 = vld [vmem:[%s5325_s1 + $0x194] ss:$8 sps:$4 sm:$0xff]  }
  0x20   :  { %2636 = vmatpush1.bf16.msra.mxu0 %v3478_v31  ;;  %2391 = vmatprep.subr.bf16.mxu1 %v3479_v32  ;;  %v3560_v31 = vld [vmem:[%s5325_s1 + $0x750] ss:$8 sps:$4 sm:$0xff]   ;;  %v3565_v32 = vld [vmem:[%s5325_s1 + $0x164] ss:$8 sps:$4 sm:$0xff]   ;;  %v3611_v6 = vld [vmem:[%s5325_s1 + $0x1e0] ss:$8 sps:$4 sm:$0xff]  }
  0x21   :  { %2637 = vmatprep.subr.bf16.mxu0 %v3481_v33  ;;  %v3568_v33 = vld [vmem:[%s5325_s1 + $0x764] ss:$8 sps:$4 sm:$0xff]   ;;  %v3581_v50 = vld [vmem:[%s5325_s1 + $0x190] ss:$8 sps:$4 sm:$0xff]  }
  0x22   :  { %v3592_v53 = vld [vmem:[%s5325_s1 + $0x7a4] ss:$8 sps:$4 sm:$0xff]  }
  0x23   :  { %2392 = vmatpush1.bf16.msra.mxu1 %v3483_v34  ;;  %v24_v34 = vld [vmem:[%s5326_s0 + $0x18] sm:$0xff]  ;;  %v3616_v5 = vld [vmem:[%s5325_s1 + $0x7e4] ss:$8 sps:$4 sm:$0xff]  }
  0x24   :  { %2638 = vmatpush1.bf16.msra.mxu0 %v3484_v35  ;;  %2393 = vmatprep.subr.bf16.mxu1 %v3485_v36  ;;  %v3563_v35 = vld [vmem:[%s5325_s1 + $0x160] ss:$8 sps:$4 sm:$0xff]   ;;  %v48_v36 = vpack.c.bf16 %v24_v34, %v24_v34  ;;  %v3641_v34 = vld [vmem:[%s5325_s1 + $0x230] ss:$8 sps:$4 sm:$0xff]  }
  0x25   :  { %2639 = vmatprep.subr.bf16.mxu0 %v3487_v37  ;;  %v3566_v37 = vld [vmem:[%s5325_s1 + $0x760] ss:$8 sps:$4 sm:$0xff]  }
  0x27   :  { %2394 = vmatpush1.bf16.msra.mxu1 %v3489_v38  ;;  %v36_v38 = vld [vmem:[%s5326_s0 + $0x78] sm:$0xff] }
  0x28   :  { %2640 = vmatpush1.bf16.msra.mxu0 %v3490_v39  ;;  %2395 = vmatprep.subr.bf16.mxu1 %v3491_v40  ;;  %v3571_v39 = vld [vmem:[%s5325_s1 + $0x174] ss:$8 sps:$4 sm:$0xff]  }
  0x29   :  { %2641 = vmatprep.subr.bf16.mxu0 %v3493_v41  ;;  %v3574_v40 = vld [vmem:[%s5325_s1 + $0x774] ss:$8 sps:$4 sm:$0xff]   ;;  %v60_v41 = vpack.c.bf16 %v36_v38, %v36_v38  ;;  %v3647_v38 = vld [vmem:[%s5325_s1 + $0x240] ss:$8 sps:$4 sm:$0xff]  }
  0x2b   :  { %2396 = vmatpush1.bf16.msra.mxu1 %v3495_v42  ;;  %v3569_v42 = vld [vmem:[%s5325_s1 + $0x170] ss:$8 sps:$4 sm:$0xff]  }
  0x2c   :  { %2642 = vmatpush1.bf16.msra.mxu0 %v3496_v43  ;;  %2397 = vmatprep.subr.bf16.mxu1 %v3497_v44  ;;  %v3572_v43 = vld [vmem:[%s5325_s1 + $0x770] ss:$8 sps:$4 sm:$0xff]   ;;  %v3577_v44 = vld [vmem:[%s5325_s1 + $0x184] ss:$8 sps:$4 sm:$0xff]  }
  0x2d   :  { %2643 = vmatprep.subr.bf16.mxu0 %v3499_v45  ;;  %v3580_v45 = vld [vmem:[%s5325_s1 + $0x784] ss:$8 sps:$4 sm:$0xff]  }
  0x2f   :  { %2398 = vmatpush1.bf16.msra.mxu1 %v3501_v47  ;;  %v3578_v47 = vld [vmem:[%s5325_s1 + $0x780] ss:$8 sps:$4 sm:$0xff]  }
  0x30   :  { %2644 = vmatpush1.bf16.msra.mxu0 %v3502_v49  ;;  %2399 = vmatprep.subr.bf16.mxu1 %v3503_v51  ;;  %v3586_v49 = vld [vmem:[%s5325_s1 + $0x794] ss:$8 sps:$4 sm:$0xff]   ;;  %v3584_v51 = vld [vmem:[%s5325_s1 + $0x790] ss:$8 sps:$4 sm:$0xff]  }
  0x31   :  { %2645 = vmatprep.subr.bf16.mxu0 %v3505_v52  ;;  %v3589_v52 = vld [vmem:[%s5325_s1 + $0x1a4] ss:$8 sps:$4 sm:$0xff]  }
  0x33   :  { %2400 = vmatpush1.bf16.msra.mxu1 %v3507_v54  ;;  %v3587_v54 = vld [vmem:[%s5325_s1 + $0x1a0] ss:$8 sps:$4 sm:$0xff]  }
  0x34   :  { %2646 = vmatpush1.bf16.msra.mxu0 %v3508_v55  ;;  %2401 = vmatprep.subr.bf16.mxu1 %v3509_v56  ;;  %v3590_v55 = vld [vmem:[%s5325_s1 + $0x7a0] ss:$8 sps:$4 sm:$0xff]   ;;  %v3595_v56 = vld [vmem:[%s5325_s1 + $0x1b4] ss:$8 sps:$4 sm:$0xff]  }
  0x35   :  { %2647 = vmatprep.subr.bf16.mxu0 %v3511_v57  ;;  %v3598_v57 = vld [vmem:[%s5325_s1 + $0x7b4] ss:$8 sps:$4 sm:$0xff]  }
  0x37   :  { %2402 = vmatpush1.bf16.msra.mxu1 %v3513_v58  ;;  %v3593_v58 = vld [vmem:[%s5325_s1 + $0x1b0] ss:$8 sps:$4 sm:$0xff]  }
  0x38   :  { %2648 = vmatpush1.bf16.msra.mxu0 %v3514_v59  ;;  %2403 = vmatprep.subr.bf16.mxu1 %v3515_v60  ;;  %v3596_v59 = vld [vmem:[%s5325_s1 + $0x7b0] ss:$8 sps:$4 sm:$0xff]   ;;  %v3601_v60 = vld [vmem:[%s5325_s1 + $0x1c4] ss:$8 sps:$4 sm:$0xff]  }
  0x39   :  { %2649 = vmatprep.subr.bf16.mxu0 %v3517_v61  ;;  %v3604_v61 = vld [vmem:[%s5325_s1 + $0x7c4] ss:$8 sps:$4 sm:$0xff]  }
  0x3b   :  { %2404 = vmatpush1.bf16.msra.mxu1 %v3519_v62  ;;  %v3599_v62 = vld [vmem:[%s5325_s1 + $0x1c0] ss:$8 sps:$4 sm:$0xff]  }
  0x3c   :  { %2650 = vmatpush1.bf16.msra.mxu0 %v3520_v63  ;;  %2405 = vmatprep.subr.bf16.mxu1 %v3521_v0  ;;  %v3602_v63 = vld [vmem:[%s5325_s1 + $0x7c0] ss:$8 sps:$4 sm:$0xff]   ;;  %v3607_v0 = vld [vmem:[%s5325_s1 + $0x1d4] ss:$8 sps:$4 sm:$0xff]  }
  0x3d   :  { %2651 = vmatprep.subr.bf16.mxu0 %v3523_v1  ;;  %v3610_v1 = vld [vmem:[%s5325_s1 + $0x7d4] ss:$8 sps:$4 sm:$0xff]  }
  0x3f   :  { %2406 = vmatpush1.bf16.msra.mxu1 %v3525_v2  ;;  %v3605_v2 = vld [vmem:[%s5325_s1 + $0x1d0] ss:$8 sps:$4 sm:$0xff]  }
  0x40   :  { %2652 = vmatpush1.bf16.msra.mxu0 %v3526_v3  ;;  %2416 = vmatprep.subr.bf16.mxu1 %v3529_v4  ;;  %v3608_v3 = vld [vmem:[%s5325_s1 + $0x7d0] ss:$8 sps:$4 sm:$0xff]   ;;  %v3613_v4 = vld [vmem:[%s5325_s1 + $0x1e4] ss:$8 sps:$4 sm:$0xff]  }
  0x41   :  { %2662 = vmatprep.subr.bf16.mxu0 %v3532_v7  ;;  %v3614_v7 = vld [vmem:[%s5325_s1 + $0x7e0] ss:$8 sps:$4 sm:$0xff]  }
  0x42   :  { %2408 = vmatmul.mubr.bf16.vlgmr.msra.gmra.mrb[0].mxu1 %v45_v10  ;;  %v3617_v10 = vld [vmem:[%s5325_s1 + $0x1f0] ss:$8 sps:$4 sm:$0xff]  }
  0x43   :  { %2654 = vmatmul.mubr.bf16.vlgmr.msra.gmra.mrb[0].mxu0 %v57_v11  ;;  %2417 = vmatpush1.bf16.msra.mxu1 %v3527_v8  ;;  %v3619_v8 = vld [vmem:[%s5325_s1 + $0x1f4] ss:$8 sps:$4 sm:$0xff]   ;;  %v3620_v11 = vld [vmem:[%s5325_s1 + $0x7f0] ss:$8 sps:$4 sm:$0xff]  }
  0x44   :  { %2663 = vmatpush1.bf16.msra.mxu0 %v3530_v9  ;;  %2418 = vmatprep.subr.bf16.mxu1 %v3535_v12  ;;  %v3622_v9 = vld [vmem:[%s5325_s1 + $0x7f4] ss:$8 sps:$4 sm:$0xff]   ;;  %v3625_v12 = vld [vmem:[%s5325_s1 + $0x204] ss:$8 sps:$4 sm:$0xff]  }
  0x45   :  { %2664 = vmatprep.subr.bf16.mxu0 %v3538_v13  ;;  %2448 = vmatprep.mubr.bf16.mxu1 %v48_v36  ;;  %v23_v13 = vld [vmem:[%s5326_s0 + $0x10] sm:$0xff]  ;;  %v3649_v36 = vld [vmem:[%s5325_s1 + $0x244] ss:$8 sps:$4 sm:$0xff]  }
  0x46   :  { %2694 = vmatprep.mubr.bf16.mxu0 %v60_v41  ;;  %v3658_v41 = vld [vmem:[%s5325_s1 + $0x854] ss:$8 sps:$4 sm:$0xff]  }
  0x47   :  { %2419 = vmatpush1.bf16.msra.mxu1 %v3533_v14  ;;  %v35_v14 = vld [vmem:[%s5326_s0 + $0x70] sm:$0xff] }
  0x48   :  { %2665 = vmatpush1.bf16.msra.mxu0 %v3536_v15  ;;  %2420 = vmatprep.subr.bf16.mxu1 %v3541_v16  ;;  %v3628_v15 = vld [vmem:[%s5325_s1 + $0x804] ss:$8 sps:$4 sm:$0xff]   ;;  %v3623_v16 = vld [vmem:[%s5325_s1 + $0x200] ss:$8 sps:$4 sm:$0xff]  }
  0x49   :  { %2666 = vmatprep.subr.bf16.mxu0 %v3544_v17  ;;  %v3626_v17 = vld [vmem:[%s5325_s1 + $0x800] ss:$8 sps:$4 sm:$0xff]  }
  0x4b   :  { %2421 = vmatpush1.bf16.msra.mxu1 %v3539_v18  ;;  %v47_v18 = vpack.c.bf16 %v23_v13, %v23_v13  ;;  %v3712_v13 = vld [vmem:[%s5325_s1 + $0x8e4] ss:$8 sps:$4 sm:$0xff]  }
  0x4c   :  { %2667 = vmatpush1.bf16.msra.mxu0 %v3542_v19  ;;  %2422 = vmatprep.subr.bf16.mxu1 %v3547_v20  ;;  %v59_v19 = vpack.c.bf16 %v35_v14, %v35_v14  ;;  %v3631_v20 = vld [vmem:[%s5325_s1 + $0x214] ss:$8 sps:$4 sm:$0xff]   ;;  %v3707_v14 = vld [vmem:[%s5325_s1 + $0x2e0] ss:$8 sps:$4 sm:$0xff]  }
  0x4d   :  { %2668 = vmatprep.subr.bf16.mxu0 %v3550_v21  ;;  %v3634_v21 = vld [vmem:[%s5325_s1 + $0x814] ss:$8 sps:$4 sm:$0xff]  }
  0x4f   :  { %2423 = vmatpush1.bf16.msra.mxu1 %v3545_v22  ;;  %v26_v22 = vld [vmem:[%s5326_s0 + $0x28] sm:$0xff] }
  0x50   :  { %2669 = vmatpush1.bf16.msra.mxu0 %v3548_v23  ;;  %2424 = vmatprep.subr.bf16.mxu1 %v3553_v24  ;;  %v3629_v23 = vld [vmem:[%s5325_s1 + $0x210] ss:$8 sps:$4 sm:$0xff]   ;;  %v50_v24 = vpack.c.bf16 %v26_v22, %v26_v22  ;;  %v37_v22 = vld [vmem:[%s5326_s0 + $0x80] sm:$0xff] }
  0x51   :  { %2670 = vmatprep.subr.bf16.mxu0 %v3556_v25  ;;  %v3632_v25 = vld [vmem:[%s5325_s1 + $0x810] ss:$8 sps:$4 sm:$0xff]  }
  0x53   :  { %2425 = vmatpush1.bf16.msra.mxu1 %v3551_v26  ;;  %v38_v26 = vld [vmem:[%s5326_s0 + $0x88] sm:$0xff] }
  0x54   :  { %2671 = vmatpush1.bf16.msra.mxu0 %v3554_v27  ;;  %2426 = vmatprep.subr.bf16.mxu1 %v3559_v28  ;;  %v3637_v27 = vld [vmem:[%s5325_s1 + $0x224] ss:$8 sps:$4 sm:$0xff]  }
  0x55   :  { %2672 = vmatprep.subr.bf16.mxu0 %v3562_v29  ;;  %v3640_v28 = vld [vmem:[%s5325_s1 + $0x824] ss:$8 sps:$4 sm:$0xff]   ;;  %v62_v29 = vpack.c.bf16 %v38_v26, %v38_v26 }
  0x57   :  { %2427 = vmatpush1.bf16.msra.mxu1 %v3557_v30  ;;  %v3635_v30 = vld [vmem:[%s5325_s1 + $0x220] ss:$8 sps:$4 sm:$0xff]  }
  0x58   :  { %2673 = vmatpush1.bf16.msra.mxu0 %v3560_v31  ;;  %2428 = vmatprep.subr.bf16.mxu1 %v3565_v32  ;;  %v3638_v31 = vld [vmem:[%s5325_s1 + $0x820] ss:$8 sps:$4 sm:$0xff]   ;;  %v3643_v32 = vld [vmem:[%s5325_s1 + $0x234] ss:$8 sps:$4 sm:$0xff]  }
  0x59   :  { %2674 = vmatprep.subr.bf16.mxu0 %v3568_v33  ;;  %v3646_v33 = vld [vmem:[%s5325_s1 + $0x834] ss:$8 sps:$4 sm:$0xff]  }
  0x5b   :  { %2429 = vmatpush1.bf16.msra.mxu1 %v3563_v35  ;;  %v3644_v35 = vld [vmem:[%s5325_s1 + $0x830] ss:$8 sps:$4 sm:$0xff]  }
  0x5c   :  { %2675 = vmatpush1.bf16.msra.mxu0 %v3566_v37  ;;  %2430 = vmatprep.subr.bf16.mxu1 %v3571_v39  ;;  %v3652_v37 = vld [vmem:[%s5325_s1 + $0x844] ss:$8 sps:$4 sm:$0xff]   ;;  %v3650_v39 = vld [vmem:[%s5325_s1 + $0x840] ss:$8 sps:$4 sm:$0xff]  }
  0x5d   :  { %2676 = vmatprep.subr.bf16.mxu0 %v3574_v40  ;;  %v3655_v40 = vld [vmem:[%s5325_s1 + $0x254] ss:$8 sps:$4 sm:$0xff]  }
  0x5f   :  { %2431 = vmatpush1.bf16.msra.mxu1 %v3569_v42  ;;  %v3653_v42 = vld [vmem:[%s5325_s1 + $0x250] ss:$8 sps:$4 sm:$0xff]  }
  0x60   :  { %2677 = vmatpush1.bf16.msra.mxu0 %v3572_v43  ;;  %2432 = vmatprep.subr.bf16.mxu1 %v3577_v44  ;;  %v3656_v43 = vld [vmem:[%s5325_s1 + $0x850] ss:$8 sps:$4 sm:$0xff]   ;;  %v3661_v44 = vld [vmem:[%s5325_s1 + $0x264] ss:$8 sps:$4 sm:$0xff]  }
  0x61   :  { %2678 = vmatprep.subr.bf16.mxu0 %v3580_v45  ;;  %v3664_v45 = vld [vmem:[%s5325_s1 + $0x864] ss:$8 sps:$4 sm:$0xff]  }
  0x63   :  { %2433 = vmatpush1.bf16.msra.mxu1 %v3575_v46  ;;  %v3659_v46 = vld [vmem:[%s5325_s1 + $0x260] ss:$8 sps:$4 sm:$0xff]  }
  0x64   :  { %2679 = vmatpush1.bf16.msra.mxu0 %v3578_v47  ;;  %2434 = vmatprep.subr.bf16.mxu1 %v3583_v48  ;;  %v3662_v47 = vld [vmem:[%s5325_s1 + $0x860] ss:$8 sps:$4 sm:$0xff]   ;;  %v3667_v48 = vld [vmem:[%s5325_s1 + $0x274] ss:$8 sps:$4 sm:$0xff]  }
  0x65   :  { %2680 = vmatprep.subr.bf16.mxu0 %v3586_v49  ;;  %v3670_v49 = vld [vmem:[%s5325_s1 + $0x874] ss:$8 sps:$4 sm:$0xff]  }
  0x67   :  { %2435 = vmatpush1.bf16.msra.mxu1 %v3581_v50  ;;  %v3665_v50 = vld [vmem:[%s5325_s1 + $0x270] ss:$8 sps:$4 sm:$0xff]  }
  0x68   :  { %2681 = vmatpush1.bf16.msra.mxu0 %v3584_v51  ;;  %2436 = vmatprep.subr.bf16.mxu1 %v3589_v52  ;;  %v3668_v51 = vld [vmem:[%s5325_s1 + $0x870] ss:$8 sps:$4 sm:$0xff]   ;;  %v3673_v52 = vld [vmem:[%s5325_s1 + $0x284] ss:$8 sps:$4 sm:$0xff]  }
  0x69   :  { %2682 = vmatprep.subr.bf16.mxu0 %v3592_v53  ;;  %v3676_v53 = vld [vmem:[%s5325_s1 + $0x884] ss:$8 sps:$4 sm:$0xff]  }
  0x6b   :  { %2437 = vmatpush1.bf16.msra.mxu1 %v3587_v54  ;;  %v3671_v54 = vld [vmem:[%s5325_s1 + $0x280] ss:$8 sps:$4 sm:$0xff]  }
  0x6c   :  { %2683 = vmatpush1.bf16.msra.mxu0 %v3590_v55  ;;  %2438 = vmatprep.subr.bf16.mxu1 %v3595_v56  ;;  %v3674_v55 = vld [vmem:[%s5325_s1 + $0x880] ss:$8 sps:$4 sm:$0xff]   ;;  %v3679_v56 = vld [vmem:[%s5325_s1 + $0x294] ss:$8 sps:$4 sm:$0xff]  }
  0x6d   :  { %2684 = vmatprep.subr.bf16.mxu0 %v3598_v57  ;;  %v3682_v57 = vld [vmem:[%s5325_s1 + $0x894] ss:$8 sps:$4 sm:$0xff]  }
  0x6f   :  { %2439 = vmatpush1.bf16.msra.mxu1 %v3593_v58  ;;  %v3677_v58 = vld [vmem:[%s5325_s1 + $0x290] ss:$8 sps:$4 sm:$0xff]  }
  0x70   :  { %2685 = vmatpush1.bf16.msra.mxu0 %v3596_v59  ;;  %2440 = vmatprep.subr.bf16.mxu1 %v3601_v60  ;;  %v3680_v59 = vld [vmem:[%s5325_s1 + $0x890] ss:$8 sps:$4 sm:$0xff]   ;;  %v3685_v60 = vld [vmem:[%s5325_s1 + $0x2a4] ss:$8 sps:$4 sm:$0xff]  }
  0x71   :  { %2686 = vmatprep.subr.bf16.mxu0 %v3604_v61  ;;  %v3688_v61 = vld [vmem:[%s5325_s1 + $0x8a4] ss:$8 sps:$4 sm:$0xff]  }
  0x73   :  { %2441 = vmatpush1.bf16.msra.mxu1 %v3599_v62  ;;  %v3683_v62 = vld [vmem:[%s5325_s1 + $0x2a0] ss:$8 sps:$4 sm:$0xff]  }
  0x74   :  { %2687 = vmatpush1.bf16.msra.mxu0 %v3602_v63  ;;  %2442 = vmatprep.subr.bf16.mxu1 %v3607_v0  ;;  %v3686_v63 = vld [vmem:[%s5325_s1 + $0x8a0] ss:$8 sps:$4 sm:$0xff]   ;;  %v3691_v0 = vld [vmem:[%s5325_s1 + $0x2b4] ss:$8 sps:$4 sm:$0xff]  }
  0x75   :  { %2688 = vmatprep.subr.bf16.mxu0 %v3610_v1  ;;  %v3694_v1 = vld [vmem:[%s5325_s1 + $0x8b4] ss:$8 sps:$4 sm:$0xff]  }
  0x77   :  { %2443 = vmatpush1.bf16.msra.mxu1 %v3605_v2  ;;  %v3689_v2 = vld [vmem:[%s5325_s1 + $0x2b0] ss:$8 sps:$4 sm:$0xff]  }
  0x78   :  { %2689 = vmatpush1.bf16.msra.mxu0 %v3608_v3  ;;  %2444 = vmatprep.subr.bf16.mxu1 %v3613_v4  ;;  %v3692_v3 = vld [vmem:[%s5325_s1 + $0x8b0] ss:$8 sps:$4 sm:$0xff]   ;;  %v3697_v4 = vld [vmem:[%s5325_s1 + $0x2c4] ss:$8 sps:$4 sm:$0xff]  }
  0x79   :  { %2690 = vmatprep.subr.bf16.mxu0 %v3616_v5  ;;  %v3700_v5 = vld [vmem:[%s5325_s1 + $0x8c4] ss:$8 sps:$4 sm:$0xff]  }
  0x7b   :  { %2445 = vmatpush1.bf16.msra.mxu1 %v3611_v6  ;;  %v3695_v6 = vld [vmem:[%s5325_s1 + $0x2c0] ss:$8 sps:$4 sm:$0xff]  }
  0x7c   :  { %2691 = vmatpush1.bf16.msra.mxu0 %v3614_v7  ;;  %2446 = vmatprep.subr.bf16.mxu1 %v3619_v8  ;;  %v3698_v7 = vld [vmem:[%s5325_s1 + $0x8c0] ss:$8 sps:$4 sm:$0xff]   ;;  %v3703_v8 = vld [vmem:[%s5325_s1 + $0x2d4] ss:$8 sps:$4 sm:$0xff]  }
  0x7d   :  { %2692 = vmatprep.subr.bf16.mxu0 %v3622_v9  ;;  %v3706_v9 = vld [vmem:[%s5325_s1 + $0x8d4] ss:$8 sps:$4 sm:$0xff]  }
  0x7f   :  { %2447 = vmatpush1.bf16.msra.mxu1 %v3617_v10  ;;  %v3701_v10 = vld [vmem:[%s5325_s1 + $0x2d0] ss:$8 sps:$4 sm:$0xff]  }
  0x80   :  { %2693 = vmatpush1.bf16.msra.mxu0 %v3620_v11  ;;  %2457 = vmatprep.subr.bf16.mxu1 %v3625_v12  ;;  %v3704_v11 = vld [vmem:[%s5325_s1 + $0x8d0] ss:$8 sps:$4 sm:$0xff]   ;;  %v3709_v12 = vld [vmem:[%s5325_s1 + $0x2e4] ss:$8 sps:$4 sm:$0xff]  }
  0x81   :  { %2703 = vmatprep.subr.bf16.mxu0 %v3628_v15  ;;  %v3710_v15 = vld [vmem:[%s5325_s1 + $0x8e0] ss:$8 sps:$4 sm:$0xff]  }
  0x82   :  { %2449 = vmatmul.mubr.bf16.vlgmr.msra.gmra.mrb[0].mxu1 %v47_v18  ;;  %v3713_v18 = vld [vmem:[%s5325_s1 + $0x2f0] ss:$8 sps:$4 sm:$0xff]  }
  0x83   :  { %2695 = vmatmul.mubr.bf16.vlgmr.msra.gmra.mrb[0].mxu0 %v59_v19  ;;  %2458 = vmatpush1.bf16.msra.mxu1 %v3623_v16  ;;  %v3715_v16 = vld [vmem:[%s5325_s1 + $0x2f4] ss:$8 sps:$4 sm:$0xff]   ;;  %v3716_v19 = vld [vmem:[%s5325_s1 + $0x8f0] ss:$8 sps:$4 sm:$0xff]  }
  0x84   :  { %2704 = vmatpush1.bf16.msra.mxu0 %v3626_v17  ;;  %2459 = vmatprep.subr.bf16.mxu1 %v3631_v20  ;;  %v3718_v17 = vld [vmem:[%s5325_s1 + $0x8f4] ss:$8 sps:$4 sm:$0xff]   ;;  %v3721_v20 = vld [vmem:[%s5325_s1 + $0x304] ss:$8 sps:$4 sm:$0xff]  }
  0x85   :  { %2705 = vmatprep.subr.bf16.mxu0 %v3634_v21  ;;  %2489 = vmatprep.mubr.bf16.mxu1 %v50_v24  ;;  %v25_v21 = vld [vmem:[%s5326_s0 + $0x20] sm:$0xff] }
  0x86   :  { %2735 = vmatprep.mubr.bf16.mxu0 %v62_v29  ;;  %v3719_v24 = vld [vmem:[%s5325_s1 + $0x300] ss:$8 sps:$4 sm:$0xff]   ;;  %v49_v26 = vpack.c.bf16 %v25_v21, %v25_v21  ;;  %v40_v29 = vld [vmem:[%s5326_s0 + $0x98] sm:$0xff]  ;;  %v3808_v21 = vld [vmem:[%s5325_s1 + $0x9e4] ss:$8 sps:$4 sm:$0xff]  }
  0x87   :  { %2460 = vmatpush1.bf16.msra.mxu1 %v3629_v23  ;;  %v3724_v23 = vld [vmem:[%s5325_s1 + $0x904] ss:$8 sps:$4 sm:$0xff]  }
  0x88   :  { %2706 = vmatpush1.bf16.msra.mxu0 %v3632_v25  ;;  %2461 = vmatprep.subr.bf16.mxu1 %v3637_v27  ;;  %v3722_v25 = vld [vmem:[%s5325_s1 + $0x900] ss:$8 sps:$4 sm:$0xff]   ;;  %v61_v27 = vpack.c.bf16 %v37_v22, %v37_v22 }
  0x89   :  { %2707 = vmatprep.subr.bf16.mxu0 %v3640_v28  ;;  %v28_v28 = vld [vmem:[%s5326_s0 + $0x38] sm:$0xff]  ;;  %v3803_v22 = vld [vmem:[%s5325_s1 + $0x3e0] ss:$8 sps:$4 sm:$0xff]  }
  0x8b   :  { %2462 = vmatpush1.bf16.msra.mxu1 %v3635_v30  ;;  %v3727_v30 = vld [vmem:[%s5325_s1 + $0x314] ss:$8 sps:$4 sm:$0xff]  }
  0x8c   :  { %2708 = vmatpush1.bf16.msra.mxu0 %v3638_v31  ;;  %2463 = vmatprep.subr.bf16.mxu1 %v3643_v32  ;;  %v3730_v31 = vld [vmem:[%s5325_s1 + $0x914] ss:$8 sps:$4 sm:$0xff]   ;;  %v52_v32 = vpack.c.bf16 %v28_v28, %v28_v28  ;;  %v3817_v28 = vld [vmem:[%s5325_s1 + $0x404] ss:$8 sps:$4 sm:$0xff]  }
  0x8d   :  { %2709 = vmatprep.subr.bf16.mxu0 %v3646_v33  ;;  %v64_v33 = vpack.c.bf16 %v40_v29, %v40_v29  ;;  %v27_v29 = vld [vmem:[%s5326_s0 + $0x30] sm:$0xff] }
  0x8f   :  { %2464 = vmatpush1.bf16.msra.mxu1 %v3641_v34  ;;  %v3725_v34 = vld [vmem:[%s5325_s1 + $0x310] ss:$8 sps:$4 sm:$0xff]  }
  0x90   :  { %2710 = vmatpush1.bf16.msra.mxu0 %v3644_v35  ;;  %2465 = vmatprep.subr.bf16.mxu1 %v3649_v36  ;;  %v3728_v35 = vld [vmem:[%s5325_s1 + $0x910] ss:$8 sps:$4 sm:$0xff]   ;;  %v3733_v36 = vld [vmem:[%s5325_s1 + $0x324] ss:$8 sps:$4 sm:$0xff]  }
  0x91   :  { %2711 = vmatprep.subr.bf16.mxu0 %v3652_v37  ;;  %v3736_v37 = vld [vmem:[%s5325_s1 + $0x924] ss:$8 sps:$4 sm:$0xff]  }
  0x93   :  { %2466 = vmatpush1.bf16.msra.mxu1 %v3647_v38  ;;  %v3731_v38 = vld [vmem:[%s5325_s1 + $0x320] ss:$8 sps:$4 sm:$0xff]  }
  0x94   :  { %2712 = vmatpush1.bf16.msra.mxu0 %v3650_v39  ;;  %2467 = vmatprep.subr.bf16.mxu1 %v3655_v40  ;;  %v3734_v39 = vld [vmem:[%s5325_s1 + $0x920] ss:$8 sps:$4 sm:$0xff]   ;;  %v3739_v40 = vld [vmem:[%s5325_s1 + $0x334] ss:$8 sps:$4 sm:$0xff]  }
  0x95   :  { %2713 = vmatprep.subr.bf16.mxu0 %v3658_v41  ;;  %v3742_v41 = vld [vmem:[%s5325_s1 + $0x934] ss:$8 sps:$4 sm:$0xff]  }
  0x97   :  { %2468 = vmatpush1.bf16.msra.mxu1 %v3653_v42  ;;  %v3737_v42 = vld [vmem:[%s5325_s1 + $0x330] ss:$8 sps:$4 sm:$0xff]  }
  0x98   :  { %2714 = vmatpush1.bf16.msra.mxu0 %v3656_v43  ;;  %2469 = vmatprep.subr.bf16.mxu1 %v3661_v44  ;;  %v3740_v43 = vld [vmem:[%s5325_s1 + $0x930] ss:$8 sps:$4 sm:$0xff]   ;;  %v3745_v44 = vld [vmem:[%s5325_s1 + $0x344] ss:$8 sps:$4 sm:$0xff]  }
  0x99   :  { %2715 = vmatprep.subr.bf16.mxu0 %v3664_v45  ;;  %v3748_v45 = vld [vmem:[%s5325_s1 + $0x944] ss:$8 sps:$4 sm:$0xff]  }
  0x9b   :  { %2470 = vmatpush1.bf16.msra.mxu1 %v3659_v46  ;;  %v3743_v46 = vld [vmem:[%s5325_s1 + $0x340] ss:$8 sps:$4 sm:$0xff]  }
  0x9c   :  { %2716 = vmatpush1.bf16.msra.mxu0 %v3662_v47  ;;  %2471 = vmatprep.subr.bf16.mxu1 %v3667_v48  ;;  %v3746_v47 = vld [vmem:[%s5325_s1 + $0x940] ss:$8 sps:$4 sm:$0xff]   ;;  %v3751_v48 = vld [vmem:[%s5325_s1 + $0x354] ss:$8 sps:$4 sm:$0xff]  }
  0x9d   :  { %2717 = vmatprep.subr.bf16.mxu0 %v3670_v49  ;;  %v3754_v49 = vld [vmem:[%s5325_s1 + $0x954] ss:$8 sps:$4 sm:$0xff]  }
  0x9f   :  { %2472 = vmatpush1.bf16.msra.mxu1 %v3665_v50  ;;  %v3749_v50 = vld [vmem:[%s5325_s1 + $0x350] ss:$8 sps:$4 sm:$0xff]  }
  0xa0   :  { %2718 = vmatpush1.bf16.msra.mxu0 %v3668_v51  ;;  %2473 = vmatprep.subr.bf16.mxu1 %v3673_v52  ;;  %v3752_v51 = vld [vmem:[%s5325_s1 + $0x950] ss:$8 sps:$4 sm:$0xff]   ;;  %v3757_v52 = vld [vmem:[%s5325_s1 + $0x364] ss:$8 sps:$4 sm:$0xff]  }
  0xa1   :  { %2719 = vmatprep.subr.bf16.mxu0 %v3676_v53  ;;  %v3760_v53 = vld [vmem:[%s5325_s1 + $0x964] ss:$8 sps:$4 sm:$0xff]  }
  0xa3   :  { %2474 = vmatpush1.bf16.msra.mxu1 %v3671_v54  ;;  %v3755_v54 = vld [vmem:[%s5325_s1 + $0x360] ss:$8 sps:$4 sm:$0xff]  }
  0xa4   :  { %2720 = vmatpush1.bf16.msra.mxu0 %v3674_v55  ;;  %2475 = vmatprep.subr.bf16.mxu1 %v3679_v56  ;;  %v3758_v55 = vld [vmem:[%s5325_s1 + $0x960] ss:$8 sps:$4 sm:$0xff]   ;;  %v3763_v56 = vld [vmem:[%s5325_s1 + $0x374] ss:$8 sps:$4 sm:$0xff]  }
  0xa5   :  { %2721 = vmatprep.subr.bf16.mxu0 %v3682_v57  ;;  %v3766_v57 = vld [vmem:[%s5325_s1 + $0x974] ss:$8 sps:$4 sm:$0xff]  }
  0xa7   :  { %2476 = vmatpush1.bf16.msra.mxu1 %v3677_v58  ;;  %v3761_v58 = vld [vmem:[%s5325_s1 + $0x370] ss:$8 sps:$4 sm:$0xff]  }
  0xa8   :  { %2722 = vmatpush1.bf16.msra.mxu0 %v3680_v59  ;;  %2477 = vmatprep.subr.bf16.mxu1 %v3685_v60  ;;  %v3764_v59 = vld [vmem:[%s5325_s1 + $0x970] ss:$8 sps:$4 sm:$0xff]   ;;  %v3769_v60 = vld [vmem:[%s5325_s1 + $0x384] ss:$8 sps:$4 sm:$0xff]  }
  0xa9   :  { %2723 = vmatprep.subr.bf16.mxu0 %v3688_v61  ;;  %v3772_v61 = vld [vmem:[%s5325_s1 + $0x984] ss:$8 sps:$4 sm:$0xff]  }
  0xab   :  { %2478 = vmatpush1.bf16.msra.mxu1 %v3683_v62  ;;  %v3767_v62 = vld [vmem:[%s5325_s1 + $0x380] ss:$8 sps:$4 sm:$0xff]  }
  0xac   :  { %2724 = vmatpush1.bf16.msra.mxu0 %v3686_v63  ;;  %2479 = vmatprep.subr.bf16.mxu1 %v3691_v0  ;;  %v3770_v63 = vld [vmem:[%s5325_s1 + $0x980] ss:$8 sps:$4 sm:$0xff]   ;;  %v3775_v0 = vld [vmem:[%s5325_s1 + $0x394] ss:$8 sps:$4 sm:$0xff]  }
  0xad   :  { %2725 = vmatprep.subr.bf16.mxu0 %v3694_v1  ;;  %v3778_v1 = vld [vmem:[%s5325_s1 + $0x994] ss:$8 sps:$4 sm:$0xff]  }
  0xaf   :  { %2480 = vmatpush1.bf16.msra.mxu1 %v3689_v2  ;;  %v3773_v2 = vld [vmem:[%s5325_s1 + $0x390] ss:$8 sps:$4 sm:$0xff]  }
  0xb0   :  { %2726 = vmatpush1.bf16.msra.mxu0 %v3692_v3  ;;  %2481 = vmatprep.subr.bf16.mxu1 %v3697_v4  ;;  %v3776_v3 = vld [vmem:[%s5325_s1 + $0x990] ss:$8 sps:$4 sm:$0xff]   ;;  %v3781_v4 = vld [vmem:[%s5325_s1 + $0x3a4] ss:$8 sps:$4 sm:$0xff]  }
  0xb1   :  { %2727 = vmatprep.subr.bf16.mxu0 %v3700_v5  ;;  %v3784_v5 = vld [vmem:[%s5325_s1 + $0x9a4] ss:$8 sps:$4 sm:$0xff]  }
  0xb3   :  { %2482 = vmatpush1.bf16.msra.mxu1 %v3695_v6  ;;  %v3779_v6 = vld [vmem:[%s5325_s1 + $0x3a0] ss:$8 sps:$4 sm:$0xff]  }
  0xb4   :  { %2728 = vmatpush1.bf16.msra.mxu0 %v3698_v7  ;;  %2483 = vmatprep.subr.bf16.mxu1 %v3703_v8  ;;  %v3782_v7 = vld [vmem:[%s5325_s1 + $0x9a0] ss:$8 sps:$4 sm:$0xff]   ;;  %v3787_v8 = vld [vmem:[%s5325_s1 + $0x3b4] ss:$8 sps:$4 sm:$0xff]  }
  0xb5   :  { %2729 = vmatprep.subr.bf16.mxu0 %v3706_v9  ;;  %v3790_v9 = vld [vmem:[%s5325_s1 + $0x9b4] ss:$8 sps:$4 sm:$0xff]  }
  0xb7   :  { %2484 = vmatpush1.bf16.msra.mxu1 %v3701_v10  ;;  %v3785_v10 = vld [vmem:[%s5325_s1 + $0x3b0] ss:$8 sps:$4 sm:$0xff]  }
  0xb8   :  { %2730 = vmatpush1.bf16.msra.mxu0 %v3704_v11  ;;  %2485 = vmatprep.subr.bf16.mxu1 %v3709_v12  ;;  %v3788_v11 = vld [vmem:[%s5325_s1 + $0x9b0] ss:$8 sps:$4 sm:$0xff]   ;;  %v3793_v12 = vld [vmem:[%s5325_s1 + $0x3c4] ss:$8 sps:$4 sm:$0xff]  }
  0xb9   :  { %2731 = vmatprep.subr.bf16.mxu0 %v3712_v13  ;;  %v3796_v13 = vld [vmem:[%s5325_s1 + $0x9c4] ss:$8 sps:$4 sm:$0xff]  }
  0xbb   :  { %2486 = vmatpush1.bf16.msra.mxu1 %v3707_v14  ;;  %v3791_v14 = vld [vmem:[%s5325_s1 + $0x3c0] ss:$8 sps:$4 sm:$0xff]  }
  0xbc   :  { %2732 = vmatpush1.bf16.msra.mxu0 %v3710_v15  ;;  %2487 = vmatprep.subr.bf16.mxu1 %v3715_v16  ;;  %v3794_v15 = vld [vmem:[%s5325_s1 + $0x9c0] ss:$8 sps:$4 sm:$0xff]   ;;  %v3799_v16 = vld [vmem:[%s5325_s1 + $0x3d4] ss:$8 sps:$4 sm:$0xff]  }
  0xbd   :  { %2733 = vmatprep.subr.bf16.mxu0 %v3718_v17  ;;  %v3802_v17 = vld [vmem:[%s5325_s1 + $0x9d4] ss:$8 sps:$4 sm:$0xff]  }
  0xbf   :  { %2488 = vmatpush1.bf16.msra.mxu1 %v3713_v18  ;;  %v3797_v18 = vld [vmem:[%s5325_s1 + $0x3d0] ss:$8 sps:$4 sm:$0xff]  }
  0xc0   :  { %2734 = vmatpush1.bf16.msra.mxu0 %v3716_v19  ;;  %2498 = vmatprep.subr.bf16.mxu1 %v3721_v20  ;;  %v3800_v19 = vld [vmem:[%s5325_s1 + $0x9d0] ss:$8 sps:$4 sm:$0xff]   ;;  %v3805_v20 = vld [vmem:[%s5325_s1 + $0x3e4] ss:$8 sps:$4 sm:$0xff]  }
  0xc1   :  { %2744 = vmatprep.subr.bf16.mxu0 %v3724_v23  ;;  %v3806_v23 = vld [vmem:[%s5325_s1 + $0x9e0] ss:$8 sps:$4 sm:$0xff]  }
  0xc2   :  { %2490 = vmatmul.mubr.bf16.vlgmr.msra.gmra.mrb[0].mxu1 %v49_v26  ;;  %v3809_v26 = vld [vmem:[%s5325_s1 + $0x3f0] ss:$8 sps:$4 sm:$0xff]  }
  0xc3   :  { %2736 = vmatmul.mubr.bf16.vlgmr.msra.gmra.mrb[0].mxu0 %v61_v27  ;;  %2499 = vmatpush1.bf16.msra.mxu1 %v3719_v24  ;;  %v3811_v24 = vld [vmem:[%s5325_s1 + $0x3f4] ss:$8 sps:$4 sm:$0xff]   ;;  %v3812_v27 = vld [vmem:[%s5325_s1 + $0x9f0] ss:$8 sps:$4 sm:$0xff]  }
  0xc4   :  { %2745 = vmatpush1.bf16.msra.mxu0 %v3722_v25  ;;  %2500 = vmatprep.subr.bf16.mxu1 %v3727_v30  ;;  %v3814_v25 = vld [vmem:[%s5325_s1 + $0x9f4] ss:$8 sps:$4 sm:$0xff]  }
  0xc5   :  { %2746 = vmatprep.subr.bf16.mxu0 %v3730_v31  ;;  %2530 = vmatprep.mubr.bf16.mxu1 %v52_v32  ;;  %v39_v30 = vld [vmem:[%s5326_s0 + $0x90] sm:$0xff]  ;;  %v3820_v31 = vld [vmem:[%s5325_s1 + $0xa04] ss:$8 sps:$4 sm:$0xff]   ;;  %v3815_v32 = vld [vmem:[%s5325_s1 + $0x400] ss:$8 sps:$4 sm:$0xff]  }
  0xc6   :  { %2776 = vmatprep.mubr.bf16.mxu0 %v64_v33  ;;  %v3818_v33 = vld [vmem:[%s5325_s1 + $0xa00] ss:$8 sps:$4 sm:$0xff]  }
  0xc7   :  { %2501 = vmatpush1.bf16.msra.mxu1 %v3725_v34  ;;  %v51_v34 = vpack.c.bf16 %v27_v29, %v27_v29  ;;  %v3904_v29 = vld [vmem:[%s5325_s1 + $0xae4] ss:$8 sps:$4 sm:$0xff]  }
  0xc8   :  { %2747 = vmatpush1.bf16.msra.mxu0 %v3728_v35  ;;  %2502 = vmatprep.subr.bf16.mxu1 %v3733_v36  ;;  %v63_v35 = vpack.c.bf16 %v39_v30, %v39_v30  ;;  %v30_v36 = vld [vmem:[%s5326_s0 + $0x48] sm:$0xff] }
  0xc9   :  { %2748 = vmatprep.subr.bf16.mxu0 %v3736_v37  ;;  %v42_v37 = vld [vmem:[%s5326_s0 + $0xa8] sm:$0xff] }
  0xca   :  { %v3899_v30 = vld [vmem:[%s5325_s1 + $0x4e0] ss:$8 sps:$4 sm:$0xff]  }
  0xcb   :  { %2503 = vmatpush1.bf16.msra.mxu1 %v3731_v38  ;;  %v3823_v38 = vld [vmem:[%s5325_s1 + $0x414] ss:$8 sps:$4 sm:$0xff]  }
  0xcc   :  { %2749 = vmatpush1.bf16.msra.mxu0 %v3734_v39  ;;  %2504 = vmatprep.subr.bf16.mxu1 %v3739_v40  ;;  %v3826_v39 = vld [vmem:[%s5325_s1 + $0xa14] ss:$8 sps:$4 sm:$0xff]   ;;  %v54_v40 = vpack.c.bf16 %v30_v36, %v30_v36  ;;  %v29_v36 = vld [vmem:[%s5326_s0 + $0x40] sm:$0xff] }
  0xcd   :  { %2750 = vmatprep.subr.bf16.mxu0 %v3742_v41  ;;  %v66_v41 = vpack.c.bf16 %v42_v37, %v42_v37  ;;  %v41_v37 = vld [vmem:[%s5326_s0 + $0xa0] sm:$0xff] }
  0xcf   :  { %2505 = vmatpush1.bf16.msra.mxu1 %v3737_v42  ;;  %v3821_v42 = vld [vmem:[%s5325_s1 + $0x410] ss:$8 sps:$4 sm:$0xff]  }
  0xd0   :  { %2751 = vmatpush1.bf16.msra.mxu0 %v3740_v43  ;;  %2506 = vmatprep.subr.bf16.mxu1 %v3745_v44  ;;  %v3824_v43 = vld [vmem:[%s5325_s1 + $0xa10] ss:$8 sps:$4 sm:$0xff]   ;;  %v3829_v44 = vld [vmem:[%s5325_s1 + $0x424] ss:$8 sps:$4 sm:$0xff]  }
  0xd1   :  { %2752 = vmatprep.subr.bf16.mxu0 %v3748_v45  ;;  %v3832_v45 = vld [vmem:[%s5325_s1 + $0xa24] ss:$8 sps:$4 sm:$0xff]  }
  0xd3   :  { %2507 = vmatpush1.bf16.msra.mxu1 %v3743_v46  ;;  %v3827_v46 = vld [vmem:[%s5325_s1 + $0x420] ss:$8 sps:$4 sm:$0xff]  }
  0xd4   :  { %2753 = vmatpush1.bf16.msra.mxu0 %v3746_v47  ;;  %2508 = vmatprep.subr.bf16.mxu1 %v3751_v48  ;;  %v3830_v47 = vld [vmem:[%s5325_s1 + $0xa20] ss:$8 sps:$4 sm:$0xff]   ;;  %v3835_v48 = vld [vmem:[%s5325_s1 + $0x434] ss:$8 sps:$4 sm:$0xff]  }
  0xd5   :  { %2754 = vmatprep.subr.bf16.mxu0 %v3754_v49  ;;  %v3838_v49 = vld [vmem:[%s5325_s1 + $0xa34] ss:$8 sps:$4 sm:$0xff]  }
  0xd7   :  { %2509 = vmatpush1.bf16.msra.mxu1 %v3749_v50  ;;  %v3833_v50 = vld [vmem:[%s5325_s1 + $0x430] ss:$8 sps:$4 sm:$0xff]  }
  0xd8   :  { %2755 = vmatpush1.bf16.msra.mxu0 %v3752_v51  ;;  %2510 = vmatprep.subr.bf16.mxu1 %v3757_v52  ;;  %v3836_v51 = vld [vmem:[%s5325_s1 + $0xa30] ss:$8 sps:$4 sm:$0xff]   ;;  %v3841_v52 = vld [vmem:[%s5325_s1 + $0x444] ss:$8 sps:$4 sm:$0xff]  }
  0xd9   :  { %2756 = vmatprep.subr.bf16.mxu0 %v3760_v53  ;;  %v3844_v53 = vld [vmem:[%s5325_s1 + $0xa44] ss:$8 sps:$4 sm:$0xff]  }
  0xdb   :  { %2511 = vmatpush1.bf16.msra.mxu1 %v3755_v54  ;;  %v3839_v54 = vld [vmem:[%s5325_s1 + $0x440] ss:$8 sps:$4 sm:$0xff]  }
  0xdc   :  { %2757 = vmatpush1.bf16.msra.mxu0 %v3758_v55  ;;  %2512 = vmatprep.subr.bf16.mxu1 %v3763_v56  ;;  %v3842_v55 = vld [vmem:[%s5325_s1 + $0xa40] ss:$8 sps:$4 sm:$0xff]   ;;  %v3847_v56 = vld [vmem:[%s5325_s1 + $0x454] ss:$8 sps:$4 sm:$0xff]  }
  0xdd   :  { %2758 = vmatprep.subr.bf16.mxu0 %v3766_v57  ;;  %v3850_v57 = vld [vmem:[%s5325_s1 + $0xa54] ss:$8 sps:$4 sm:$0xff]  }
  0xdf   :  { %2513 = vmatpush1.bf16.msra.mxu1 %v3761_v58  ;;  %v3845_v58 = vld [vmem:[%s5325_s1 + $0x450] ss:$8 sps:$4 sm:$0xff]  }
  0xe0   :  { %2759 = vmatpush1.bf16.msra.mxu0 %v3764_v59  ;;  %2514 = vmatprep.subr.bf16.mxu1 %v3769_v60  ;;  %v3848_v59 = vld [vmem:[%s5325_s1 + $0xa50] ss:$8 sps:$4 sm:$0xff]   ;;  %v3853_v60 = vld [vmem:[%s5325_s1 + $0x464] ss:$8 sps:$4 sm:$0xff]  }
  0xe1   :  { %2760 = vmatprep.subr.bf16.mxu0 %v3772_v61  ;;  %v3856_v61 = vld [vmem:[%s5325_s1 + $0xa64] ss:$8 sps:$4 sm:$0xff]  }
  0xe3   :  { %2515 = vmatpush1.bf16.msra.mxu1 %v3767_v62  ;;  %v3851_v62 = vld [vmem:[%s5325_s1 + $0x460] ss:$8 sps:$4 sm:$0xff]  }
  0xe4   :  { %2761 = vmatpush1.bf16.msra.mxu0 %v3770_v63  ;;  %2516 = vmatprep.subr.bf16.mxu1 %v3775_v0  ;;  %v3854_v63 = vld [vmem:[%s5325_s1 + $0xa60] ss:$8 sps:$4 sm:$0xff]   ;;  %v3859_v0 = vld [vmem:[%s5325_s1 + $0x474] ss:$8 sps:$4 sm:$0xff]  }
  0xe5   :  { %2762 = vmatprep.subr.bf16.mxu0 %v3778_v1  ;;  %v3862_v1 = vld [vmem:[%s5325_s1 + $0xa74] ss:$8 sps:$4 sm:$0xff]  }
  0xe7   :  { %2517 = vmatpush1.bf16.msra.mxu1 %v3773_v2  ;;  %v3857_v2 = vld [vmem:[%s5325_s1 + $0x470] ss:$8 sps:$4 sm:$0xff]  }
  0xe8   :  { %2763 = vmatpush1.bf16.msra.mxu0 %v3776_v3  ;;  %2518 = vmatprep.subr.bf16.mxu1 %v3781_v4  ;;  %v3860_v3 = vld [vmem:[%s5325_s1 + $0xa70] ss:$8 sps:$4 sm:$0xff]   ;;  %v3865_v4 = vld [vmem:[%s5325_s1 + $0x484] ss:$8 sps:$4 sm:$0xff]  }
  0xe9   :  { %2764 = vmatprep.subr.bf16.mxu0 %v3784_v5  ;;  %v3868_v5 = vld [vmem:[%s5325_s1 + $0xa84] ss:$8 sps:$4 sm:$0xff]  }
  0xeb   :  { %2519 = vmatpush1.bf16.msra.mxu1 %v3779_v6  ;;  %v3863_v6 = vld [vmem:[%s5325_s1 + $0x480] ss:$8 sps:$4 sm:$0xff]  }
  0xec   :  { %2765 = vmatpush1.bf16.msra.mxu0 %v3782_v7  ;;  %2520 = vmatprep.subr.bf16.mxu1 %v3787_v8  ;;  %v3866_v7 = vld [vmem:[%s5325_s1 + $0xa80] ss:$8 sps:$4 sm:$0xff]   ;;  %v3871_v8 = vld [vmem:[%s5325_s1 + $0x494] ss:$8 sps:$4 sm:$0xff]  }
  0xed   :  { %2766 = vmatprep.subr.bf16.mxu0 %v3790_v9  ;;  %v3874_v9 = vld [vmem:[%s5325_s1 + $0xa94] ss:$8 sps:$4 sm:$0xff]  }
  0xef   :  { %2521 = vmatpush1.bf16.msra.mxu1 %v3785_v10  ;;  %v3869_v10 = vld [vmem:[%s5325_s1 + $0x490] ss:$8 sps:$4 sm:$0xff]  }
  0xf0   :  { %2767 = vmatpush1.bf16.msra.mxu0 %v3788_v11  ;;  %2522 = vmatprep.subr.bf16.mxu1 %v3793_v12  ;;  %v3872_v11 = vld [vmem:[%s5325_s1 + $0xa90] ss:$8 sps:$4 sm:$0xff]   ;;  %v3877_v12 = vld [vmem:[%s5325_s1 + $0x4a4] ss:$8 sps:$4 sm:$0xff]  }
  0xf1   :  { %2768 = vmatprep.subr.bf16.mxu0 %v3796_v13  ;;  %v3880_v13 = vld [vmem:[%s5325_s1 + $0xaa4] ss:$8 sps:$4 sm:$0xff]  }
  0xf3   :  { %2523 = vmatpush1.bf16.msra.mxu1 %v3791_v14  ;;  %v3875_v14 = vld [vmem:[%s5325_s1 + $0x4a0] ss:$8 sps:$4 sm:$0xff]  }
  0xf4   :  { %2769 = vmatpush1.bf16.msra.mxu0 %v3794_v15  ;;  %2524 = vmatprep.subr.bf16.mxu1 %v3799_v16  ;;  %v3878_v15 = vld [vmem:[%s5325_s1 + $0xaa0] ss:$8 sps:$4 sm:$0xff]   ;;  %v3883_v16 = vld [vmem:[%s5325_s1 + $0x4b4] ss:$8 sps:$4 sm:$0xff]  }
  0xf5   :  { %2770 = vmatprep.subr.bf16.mxu0 %v3802_v17  ;;  %v3886_v17 = vld [vmem:[%s5325_s1 + $0xab4] ss:$8 sps:$4 sm:$0xff]  }
  0xf7   :  { %2525 = vmatpush1.bf16.msra.mxu1 %v3797_v18  ;;  %v3881_v18 = vld [vmem:[%s5325_s1 + $0x4b0] ss:$8 sps:$4 sm:$0xff]  }
  0xf8   :  { %2771 = vmatpush1.bf16.msra.mxu0 %v3800_v19  ;;  %2526 = vmatprep.subr.bf16.mxu1 %v3805_v20  ;;  %v3884_v19 = vld [vmem:[%s5325_s1 + $0xab0] ss:$8 sps:$4 sm:$0xff]   ;;  %v3889_v20 = vld [vmem:[%s5325_s1 + $0x4c4] ss:$8 sps:$4 sm:$0xff]  }
  0xf9   :  { %2772 = vmatprep.subr.bf16.mxu0 %v3808_v21  ;;  %v3892_v21 = vld [vmem:[%s5325_s1 + $0xac4] ss:$8 sps:$4 sm:$0xff]  }
  0xfb   :  { %2527 = vmatpush1.bf16.msra.mxu1 %v3803_v22  ;;  %v3887_v22 = vld [vmem:[%s5325_s1 + $0x4c0] ss:$8 sps:$4 sm:$0xff]  }
  0xfc   :  { %2773 = vmatpush1.bf16.msra.mxu0 %v3806_v23  ;;  %2528 = vmatprep.subr.bf16.mxu1 %v3811_v24  ;;  %v3890_v23 = vld [vmem:[%s5325_s1 + $0xac0] ss:$8 sps:$4 sm:$0xff]   ;;  %v3895_v24 = vld [vmem:[%s5325_s1 + $0x4d4] ss:$8 sps:$4 sm:$0xff]  }
  0xfd   :  { %2774 = vmatprep.subr.bf16.mxu0 %v3814_v25  ;;  %v3898_v25 = vld [vmem:[%s5325_s1 + $0xad4] ss:$8 sps:$4 sm:$0xff]  }
  0xff   :  { %2529 = vmatpush1.bf16.msra.mxu1 %v3809_v26  ;;  %v3893_v26 = vld [vmem:[%s5325_s1 + $0x4d0] ss:$8 sps:$4 sm:$0xff]  }
 0x100   :  { %2775 = vmatpush1.bf16.msra.mxu0 %v3812_v27  ;;  %2539 = vmatprep.subr.bf16.mxu1 %v3817_v28  ;;  %v3896_v27 = vld [vmem:[%s5325_s1 + $0xad0] ss:$8 sps:$4 sm:$0xff]   ;;  %v3901_v28 = vld [vmem:[%s5325_s1 + $0x4e4] ss:$8 sps:$4 sm:$0xff]  }
 0x101   :  { %2785 = vmatprep.subr.bf16.mxu0 %v3820_v31  ;;  %v3902_v31 = vld [vmem:[%s5325_s1 + $0xae0] ss:$8 sps:$4 sm:$0xff]  }
 0x102   :  { %2531 = vmatmul.mubr.bf16.vlgmr.msra.gmra.mrb[0].mxu1 %v51_v34  ;;  %v3905_v34 = vld [vmem:[%s5325_s1 + $0x4f0] ss:$8 sps:$4 sm:$0xff]  }
 0x103   :  { %2777 = vmatmul.mubr.bf16.vlgmr.msra.gmra.mrb[0].mxu0 %v63_v35  ;;  %2540 = vmatpush1.bf16.msra.mxu1 %v3815_v32  ;;  %v3907_v32 = vld [vmem:[%s5325_s1 + $0x4f4] ss:$8 sps:$4 sm:$0xff]   ;;  %v3908_v35 = vld [vmem:[%s5325_s1 + $0xaf0] ss:$8 sps:$4 sm:$0xff]  }
 0x104   :  { %2786 = vmatpush1.bf16.msra.mxu0 %v3818_v33  ;;  %2541 = vmatprep.subr.bf16.mxu1 %v3823_v38  ;;  %v3910_v33 = vld [vmem:[%s5325_s1 + $0xaf4] ss:$8 sps:$4 sm:$0xff]   ;;  %v3913_v38 = vld [vmem:[%s5325_s1 + $0x504] ss:$8 sps:$4 sm:$0xff]  }
 0x105   :  { %2787 = vmatprep.subr.bf16.mxu0 %v3826_v39  ;;  %2571 = vmatprep.mubr.bf16.mxu1 %v54_v40  ;;  %v3916_v39 = vld [vmem:[%s5325_s1 + $0xb04] ss:$8 sps:$4 sm:$0xff]   ;;  %v53_v40 = vpack.c.bf16 %v29_v36, %v29_v36 }
 0x106   :  { %2817 = vmatprep.mubr.bf16.mxu0 %v66_v41  ;;  %v65_v41 = vpack.c.bf16 %v41_v37, %v41_v37  ;;  %v3997_v36 = vld [vmem:[%s5325_s1 + $0x5e4] ss:$8 sps:$4 sm:$0xff]  }
 0x107   :  { %2542 = vmatpush1.bf16.msra.mxu1 %v3821_v42  ;;  %v32_v42 = vld [vmem:[%s5326_s0 + $0x58] sm:$0xff]  ;;  %v4000_v37 = vld [vmem:[%s5325_s1 + $0xbe4] ss:$8 sps:$4 sm:$0xff]  }
 0x108   :  { %2788 = vmatpush1.bf16.msra.mxu0 %v3824_v43  ;;  %2543 = vmatprep.subr.bf16.mxu1 %v3829_v44  ;;  %v44_v43 = vld [vmem:[%s5326_s0 + $0xb8] sm:$0xff]  ;;  %v3911_v44 = vld [vmem:[%s5325_s1 + $0x500] ss:$8 sps:$4 sm:$0xff]  }
 0x109   :  { %2789 = vmatprep.subr.bf16.mxu0 %v3832_v45  ;;  %v3914_v45 = vld [vmem:[%s5325_s1 + $0xb00] ss:$8 sps:$4 sm:$0xff]  }
 0x10b   :  { %2544 = vmatpush1.bf16.msra.mxu1 %v3827_v46  ;;  %v3919_v46 = vld [vmem:[%s5325_s1 + $0x514] ss:$8 sps:$4 sm:$0xff]  }
 0x10c   :  { %2790 = vmatpush1.bf16.msra.mxu0 %v3830_v47  ;;  %2545 = vmatprep.subr.bf16.mxu1 %v3835_v48  ;;  %v3922_v47 = vld [vmem:[%s5325_s1 + $0xb14] ss:$8 sps:$4 sm:$0xff]   ;;  %v56_v48 = vpack.c.bf16 %v32_v42, %v32_v42  ;;  %v4001_v42 = vld [vmem:[%s5325_s1 + $0x5f0] ss:$8 sps:$4 sm:$0xff]  }
 0x10d   :  { %2791 = vmatprep.subr.bf16.mxu0 %v3838_v49  ;;  %v68_v49 = vpack.c.bf16 %v44_v43, %v44_v43  ;;  %v4004_v43 = vld [vmem:[%s5325_s1 + $0xbf0] ss:$8 sps:$4 sm:$0xff]  }
 0x10f   :  { %2546 = vmatpush1.bf16.msra.mxu1 %v3833_v50  ;;  %v3917_v50 = vld [vmem:[%s5325_s1 + $0x510] ss:$8 sps:$4 sm:$0xff]  }
 0x110   :  { %2792 = vmatpush1.bf16.msra.mxu0 %v3836_v51  ;;  %2547 = vmatprep.subr.bf16.mxu1 %v3841_v52  ;;  %v3920_v51 = vld [vmem:[%s5325_s1 + $0xb10] ss:$8 sps:$4 sm:$0xff]   ;;  %v3925_v52 = vld [vmem:[%s5325_s1 + $0x524] ss:$8 sps:$4 sm:$0xff]  }
 0x111   :  { %2793 = vmatprep.subr.bf16.mxu0 %v3844_v53  ;;  %v3928_v53 = vld [vmem:[%s5325_s1 + $0xb24] ss:$8 sps:$4 sm:$0xff]  }
 0x113   :  { %2548 = vmatpush1.bf16.msra.mxu1 %v3839_v54  ;;  %v3923_v54 = vld [vmem:[%s5325_s1 + $0x520] ss:$8 sps:$4 sm:$0xff]  }
 0x114   :  { %2794 = vmatpush1.bf16.msra.mxu0 %v3842_v55  ;;  %2549 = vmatprep.subr.bf16.mxu1 %v3847_v56  ;;  %v3926_v55 = vld [vmem:[%s5325_s1 + $0xb20] ss:$8 sps:$4 sm:$0xff]   ;;  %v3931_v56 = vld [vmem:[%s5325_s1 + $0x534] ss:$8 sps:$4 sm:$0xff]  }
 0x115   :  { %2795 = vmatprep.subr.bf16.mxu0 %v3850_v57  ;;  %v3934_v57 = vld [vmem:[%s5325_s1 + $0xb34] ss:$8 sps:$4 sm:$0xff]  }
 0x117   :  { %2550 = vmatpush1.bf16.msra.mxu1 %v3845_v58  ;;  %v3929_v58 = vld [vmem:[%s5325_s1 + $0x530] ss:$8 sps:$4 sm:$0xff]  }
 0x118   :  { %2796 = vmatpush1.bf16.msra.mxu0 %v3848_v59  ;;  %2551 = vmatprep.subr.bf16.mxu1 %v3853_v60  ;;  %v3932_v59 = vld [vmem:[%s5325_s1 + $0xb30] ss:$8 sps:$4 sm:$0xff]   ;;  %v3937_v60 = vld [vmem:[%s5325_s1 + $0x544] ss:$8 sps:$4 sm:$0xff]  }
 0x119   :  { %2797 = vmatprep.subr.bf16.mxu0 %v3856_v61  ;;  %v3940_v61 = vld [vmem:[%s5325_s1 + $0xb44] ss:$8 sps:$4 sm:$0xff]  }
 0x11b   :  { %2552 = vmatpush1.bf16.msra.mxu1 %v3851_v62  ;;  %v3935_v62 = vld [vmem:[%s5325_s1 + $0x540] ss:$8 sps:$4 sm:$0xff]  }
 0x11c   :  { %2798 = vmatpush1.bf16.msra.mxu0 %v3854_v63  ;;  %2553 = vmatprep.subr.bf16.mxu1 %v3859_v0  ;;  %v3938_v63 = vld [vmem:[%s5325_s1 + $0xb40] ss:$8 sps:$4 sm:$0xff]   ;;  %v3943_v0 = vld [vmem:[%s5325_s1 + $0x554] ss:$8 sps:$4 sm:$0xff]  }
 0x11d   :  { %2799 = vmatprep.subr.bf16.mxu0 %v3862_v1  ;;  %v3946_v1 = vld [vmem:[%s5325_s1 + $0xb54] ss:$8 sps:$4 sm:$0xff]  }
 0x11f   :  { %2554 = vmatpush1.bf16.msra.mxu1 %v3857_v2  ;;  %v3941_v2 = vld [vmem:[%s5325_s1 + $0x550] ss:$8 sps:$4 sm:$0xff]  }
 0x120   :  { %2800 = vmatpush1.bf16.msra.mxu0 %v3860_v3  ;;  %2555 = vmatprep.subr.bf16.mxu1 %v3865_v4  ;;  %v3944_v3 = vld [vmem:[%s5325_s1 + $0xb50] ss:$8 sps:$4 sm:$0xff]   ;;  %v3949_v4 = vld [vmem:[%s5325_s1 + $0x564] ss:$8 sps:$4 sm:$0xff]  }
 0x121   :  { %2801 = vmatprep.subr.bf16.mxu0 %v3868_v5  ;;  %v3952_v5 = vld [vmem:[%s5325_s1 + $0xb64] ss:$8 sps:$4 sm:$0xff]  }
 0x123   :  { %2556 = vmatpush1.bf16.msra.mxu1 %v3863_v6  ;;  %v3947_v6 = vld [vmem:[%s5325_s1 + $0x560] ss:$8 sps:$4 sm:$0xff]  }
 0x124   :  { %2802 = vmatpush1.bf16.msra.mxu0 %v3866_v7  ;;  %2557 = vmatprep.subr.bf16.mxu1 %v3871_v8  ;;  %v3950_v7 = vld [vmem:[%s5325_s1 + $0xb60] ss:$8 sps:$4 sm:$0xff]   ;;  %v3955_v8 = vld [vmem:[%s5325_s1 + $0x574] ss:$8 sps:$4 sm:$0xff]  }
 0x125   :  { %2803 = vmatprep.subr.bf16.mxu0 %v3874_v9  ;;  %v3958_v9 = vld [vmem:[%s5325_s1 + $0xb74] ss:$8 sps:$4 sm:$0xff]  }
 0x127   :  { %2558 = vmatpush1.bf16.msra.mxu1 %v3869_v10  ;;  %v3953_v10 = vld [vmem:[%s5325_s1 + $0x570] ss:$8 sps:$4 sm:$0xff]  }
 0x128   :  { %2804 = vmatpush1.bf16.msra.mxu0 %v3872_v11  ;;  %2559 = vmatprep.subr.bf16.mxu1 %v3877_v12  ;;  %v3956_v11 = vld [vmem:[%s5325_s1 + $0xb70] ss:$8 sps:$4 sm:$0xff]   ;;  %v3961_v12 = vld [vmem:[%s5325_s1 + $0x584] ss:$8 sps:$4 sm:$0xff]  }
 0x129   :  { %2805 = vmatprep.subr.bf16.mxu0 %v3880_v13  ;;  %v3964_v13 = vld [vmem:[%s5325_s1 + $0xb84] ss:$8 sps:$4 sm:$0xff]  }
 0x12b   :  { %2560 = vmatpush1.bf16.msra.mxu1 %v3875_v14  ;;  %v3959_v14 = vld [vmem:[%s5325_s1 + $0x580] ss:$8 sps:$4 sm:$0xff]  }
 0x12c   :  { %2806 = vmatpush1.bf16.msra.mxu0 %v3878_v15  ;;  %2561 = vmatprep.subr.bf16.mxu1 %v3883_v16  ;;  %v3962_v15 = vld [vmem:[%s5325_s1 + $0xb80] ss:$8 sps:$4 sm:$0xff]   ;;  %v3967_v16 = vld [vmem:[%s5325_s1 + $0x594] ss:$8 sps:$4 sm:$0xff]  }
 0x12d   :  { %2807 = vmatprep.subr.bf16.mxu0 %v3886_v17  ;;  %v3970_v17 = vld [vmem:[%s5325_s1 + $0xb94] ss:$8 sps:$4 sm:$0xff]  }
 0x12f   :  { %2562 = vmatpush1.bf16.msra.mxu1 %v3881_v18  ;;  %v3965_v18 = vld [vmem:[%s5325_s1 + $0x590] ss:$8 sps:$4 sm:$0xff]  }
 0x130   :  { %2808 = vmatpush1.bf16.msra.mxu0 %v3884_v19  ;;  %2563 = vmatprep.subr.bf16.mxu1 %v3889_v20  ;;  %v3968_v19 = vld [vmem:[%s5325_s1 + $0xb90] ss:$8 sps:$4 sm:$0xff]   ;;  %v3973_v20 = vld [vmem:[%s5325_s1 + $0x5a4] ss:$8 sps:$4 sm:$0xff]  }
 0x131   :  { %2809 = vmatprep.subr.bf16.mxu0 %v3892_v21  ;;  %v3976_v21 = vld [vmem:[%s5325_s1 + $0xba4] ss:$8 sps:$4 sm:$0xff]  }
 0x133   :  { %2564 = vmatpush1.bf16.msra.mxu1 %v3887_v22  ;;  %v3971_v22 = vld [vmem:[%s5325_s1 + $0x5a0] ss:$8 sps:$4 sm:$0xff]  }
 0x134   :  { %2810 = vmatpush1.bf16.msra.mxu0 %v3890_v23  ;;  %2565 = vmatprep.subr.bf16.mxu1 %v3895_v24  ;;  %v3974_v23 = vld [vmem:[%s5325_s1 + $0xba0] ss:$8 sps:$4 sm:$0xff]   ;;  %v3979_v24 = vld [vmem:[%s5325_s1 + $0x5b4] ss:$8 sps:$4 sm:$0xff]  }
 0x135   :  { %2811 = vmatprep.subr.bf16.mxu0 %v3898_v25  ;;  %v3982_v25 = vld [vmem:[%s5325_s1 + $0xbb4] ss:$8 sps:$4 sm:$0xff]  }
 0x137   :  { %2566 = vmatpush1.bf16.msra.mxu1 %v3893_v26  ;;  %v3977_v26 = vld [vmem:[%s5325_s1 + $0x5b0] ss:$8 sps:$4 sm:$0xff]  }
 0x138   :  { %2812 = vmatpush1.bf16.msra.mxu0 %v3896_v27  ;;  %2567 = vmatprep.subr.bf16.mxu1 %v3901_v28  ;;  %v3980_v27 = vld [vmem:[%s5325_s1 + $0xbb0] ss:$8 sps:$4 sm:$0xff]   ;;  %v3985_v28 = vld [vmem:[%s5325_s1 + $0x5c4] ss:$8 sps:$4 sm:$0xff]  }
 0x139   :  { %2813 = vmatprep.subr.bf16.mxu0 %v3904_v29  ;;  %v3988_v29 = vld [vmem:[%s5325_s1 + $0xbc4] ss:$8 sps:$4 sm:$0xff]  }
 0x13b   :  { %2568 = vmatpush1.bf16.msra.mxu1 %v3899_v30  ;;  %v3983_v30 = vld [vmem:[%s5325_s1 + $0x5c0] ss:$8 sps:$4 sm:$0xff]  }
 0x13c   :  { %2814 = vmatpush1.bf16.msra.mxu0 %v3902_v31  ;;  %2569 = vmatprep.subr.bf16.mxu1 %v3907_v32  ;;  %v3986_v31 = vld [vmem:[%s5325_s1 + $0xbc0] ss:$8 sps:$4 sm:$0xff]   ;;  %v3991_v32 = vld [vmem:[%s5325_s1 + $0x5d4] ss:$8 sps:$4 sm:$0xff]  }
 0x13d   :  { %2815 = vmatprep.subr.bf16.mxu0 %v3910_v33  ;;  %v3994_v33 = vld [vmem:[%s5325_s1 + $0xbd4] ss:$8 sps:$4 sm:$0xff]  }
 0x13f   :  { %2570 = vmatpush1.bf16.msra.mxu1 %v3905_v34  ;;  %v3989_v34 = vld [vmem:[%s5325_s1 + $0x5d0] ss:$8 sps:$4 sm:$0xff]  }
 0x140   :  { %2816 = vmatpush1.bf16.msra.mxu0 %v3908_v35  ;;  %2580 = vmatprep.subr.bf16.mxu1 %v3913_v38  ;;  %v3992_v35 = vld [vmem:[%s5325_s1 + $0xbd0] ss:$8 sps:$4 sm:$0xff]   ;;  %v3995_v38 = vld [vmem:[%s5325_s1 + $0x5e0] ss:$8 sps:$4 sm:$0xff]  }
 0x141   :  { %2826 = vmatprep.subr.bf16.mxu0 %v3916_v39  ;;  %v3998_v39 = vld [vmem:[%s5325_s1 + $0xbe0] ss:$8 sps:$4 sm:$0xff]  }
 0x142   :  { %2572 = vmatmul.mubr.bf16.vlgmr.msra.gmra.mrb[0].mxu1 %v53_v40  ;;  %v4003_v40 = vld [vmem:[%s5325_s1 + $0x5f4] ss:$8 sps:$4 sm:$0xff]  }
 0x143   :  { %2818 = vmatmul.mubr.bf16.vlgmr.msra.gmra.mrb[0].mxu0 %v65_v41  ;;  %2581 = vmatpush1.bf16.msra.mxu1 %v3911_v44  ;;  %v4006_v41 = vld [vmem:[%s5325_s1 + $0xbf4] ss:$8 sps:$4 sm:$0xff]  }
 0x144   :  { %2827 = vmatpush1.bf16.msra.mxu0 %v3914_v45  ;;  %2582 = vmatprep.subr.bf16.mxu1 %v3919_v46  ;;  %v31_v44 = vld [vmem:[%s5326_s0 + $0x50] sm:$0xff]  ;;  %v2869_v46 = vld [vmem:[%s5327_s3] sm:$0xff] }
 0x145   :  { %2828 = vmatprep.subr.bf16.mxu0 %v3922_v47  ;;  %2612 = vmatprep.mubr.bf16.mxu1 %v56_v48  ;;  %v43_v45 = vld [vmem:[%s5326_s0 + $0xb0] sm:$0xff]  ;;  %v2870_v47 = vld [vmem:[%s5327_s3 + $0x8] sm:$0xff]  ;;  %v55_v48 = vpack.c.bf16 %v31_v44, %v31_v44 }
 0x146   :  { %2858 = vmatprep.mubr.bf16.mxu0 %v68_v49  ;;  %v67_v49 = vpack.c.bf16 %v43_v45, %v43_v45 }
 0x147   :  { %2583 = vmatpush1.bf16.msra.mxu1 %v3917_v50  ;;  %v3360_v50 = vpack.c.bf16 %v2870_v47, %v2869_v46 }
 0x148   :  { %2829 = vmatpush1.bf16.msra.mxu0 %v3920_v51  ;;  %2584 = vmatprep.subr.bf16.mxu1 %v3925_v52  ;;  %v4007_v51 = vmov 0.0|0.0   ;;  %v2871_v52 = vld [vmem:[%s5327_s3 + $0x10] sm:$0xff] }
 0x149   :  { %2830 = vmatprep.subr.bf16.mxu0 %v3928_v53  ;;  %v2872_v53 = vld [vmem:[%s5327_s3 + $0x18] sm:$0xff] }
 0x14b   :  { %2585 = vmatpush1.bf16.msra.mxu1 %v3923_v54  ;;  %v3363_v54 = vpack.c.bf16 %v2872_v53, %v2871_v52 }
 0x14c   :  { %2831 = vmatpush1.bf16.msra.mxu0 %v3926_v55  ;;  %2586 = vmatprep.subr.bf16.mxu1 %v3931_v56  ;;  %v2873_v55 = vld [vmem:[%s5327_s3 + $0x20] sm:$0xff]  ;;  %v2874_v56 = vld [vmem:[%s5327_s3 + $0x28] sm:$0xff] }
 0x14d   :  { %2832 = vmatprep.subr.bf16.mxu0 %v3934_v57  ;;  %v3366_v57 = vpack.c.bf16 %v2874_v56, %v2873_v55 }
 0x14f   :  { %2587 = vmatpush1.bf16.msra.mxu1 %v3929_v58  ;;  %v2875_v58 = vld [vmem:[%s5327_s3 + $0x30] sm:$0xff] }
 0x150   :  { %2833 = vmatpush1.bf16.msra.mxu0 %v3932_v59  ;;  %2588 = vmatprep.subr.bf16.mxu1 %v3937_v60  ;;  %v2876_v59 = vld [vmem:[%s5327_s3 + $0x38] sm:$0xff] }
 0x151   :  { %2834 = vmatprep.subr.bf16.mxu0 %v3940_v61  ;;  %v3369_v60 = vpack.c.bf16 %v2876_v59, %v2875_v58  ;;  %v2877_v61 = vld [vmem:[%s5327_s3 + $0x40] sm:$0xff] }
 0x153   :  { %2589 = vmatpush1.bf16.msra.mxu1 %v3935_v62  ;;  %v2878_v62 = vld [vmem:[%s5327_s3 + $0x48] sm:$0xff] }
 0x154   :  { %2835 = vmatpush1.bf16.msra.mxu0 %v3938_v63  ;;  %2590 = vmatprep.subr.bf16.mxu1 %v3943_v0  ;;  %v3372_v63 = vpack.c.bf16 %v2878_v62, %v2877_v61  ;;  %v2879_v0 = vld [vmem:[%s5327_s3 + $0x50] sm:$0xff] }
 0x155   :  { %2836 = vmatprep.subr.bf16.mxu0 %v3946_v1  ;;  %v2880_v1 = vld [vmem:[%s5327_s3 + $0x58] sm:$0xff] }
 0x157   :  { %2591 = vmatpush1.bf16.msra.mxu1 %v3941_v2  ;;  %v3375_v2 = vpack.c.bf16 %v2880_v1, %v2879_v0 }
 0x158   :  { %2837 = vmatpush1.bf16.msra.mxu0 %v3944_v3  ;;  %2592 = vmatprep.subr.bf16.mxu1 %v3949_v4  ;;  %v2881_v3 = vld [vmem:[%s5327_s3 + $0x60] sm:$0xff]  ;;  %v2882_v4 = vld [vmem:[%s5327_s3 + $0x68] sm:$0xff] }
 0x159   :  { %2838 = vmatprep.subr.bf16.mxu0 %v3952_v5  ;;  %v3378_v5 = vpack.c.bf16 %v2882_v4, %v2881_v3 }
 0x15b   :  { %2593 = vmatpush1.bf16.msra.mxu1 %v3947_v6  ;;  %v2883_v6 = vld [vmem:[%s5327_s3 + $0x70] sm:$0xff] }
 0x15c   :  { %2839 = vmatpush1.bf16.msra.mxu0 %v3950_v7  ;;  %2594 = vmatprep.subr.bf16.mxu1 %v3955_v8  ;;  %v2884_v7 = vld [vmem:[%s5327_s3 + $0x78] sm:$0xff] }
 0x15d   :  { %2840 = vmatprep.subr.bf16.mxu0 %v3958_v9  ;;  %v3381_v8 = vpack.c.bf16 %v2884_v7, %v2883_v6  ;;  %v2885_v9 = vld [vmem:[%s5327_s3 + $0x80] sm:$0xff] }
 0x15f   :  { %2595 = vmatpush1.bf16.msra.mxu1 %v3953_v10  ;;  %v2886_v10 = vld [vmem:[%s5327_s3 + $0x88] sm:$0xff] }
 0x160   :  { %2841 = vmatpush1.bf16.msra.mxu0 %v3956_v11  ;;  %2596 = vmatprep.subr.bf16.mxu1 %v3961_v12  ;;  %v3384_v11 = vpack.c.bf16 %v2886_v10, %v2885_v9  ;;  %v454_v12 = vstv %s5328_s2 }
 0x161   :  { %2842 = vmatprep.subr.bf16.mxu0 %v3964_v13 }
 0x163   :  { %2597 = vmatpush1.bf16.msra.mxu1 %v3959_v14 }
 0x164   :  { %2843 = vmatpush1.bf16.msra.mxu0 %v3962_v15  ;;  %2598 = vmatprep.subr.bf16.mxu1 %v3967_v16 }
 0x165   :  { %2844 = vmatprep.subr.bf16.mxu0 %v3970_v17 }
 0x167   :  { %2599 = vmatpush1.bf16.msra.mxu1 %v3965_v18 }
 0x168   :  { %2845 = vmatpush1.bf16.msra.mxu0 %v3968_v19  ;;  %2600 = vmatprep.subr.bf16.mxu1 %v3973_v20 }
 0x169   :  { %2846 = vmatprep.subr.bf16.mxu0 %v3976_v21 }
 0x16b   :  { %2601 = vmatpush1.bf16.msra.mxu1 %v3971_v22 }
 0x16c   :  { %2847 = vmatpush1.bf16.msra.mxu0 %v3974_v23  ;;  %2602 = vmatprep.subr.bf16.mxu1 %v3979_v24 }
 0x16d   :  { %2848 = vmatprep.subr.bf16.mxu0 %v3982_v25 }
 0x16f   :  { %2603 = vmatpush1.bf16.msra.mxu1 %v3977_v26 }
 0x170   :  { %2849 = vmatpush1.bf16.msra.mxu0 %v3980_v27  ;;  %2604 = vmatprep.subr.bf16.mxu1 %v3985_v28  ;;  %v3357_v27 = vld [vmem:[%s5329_s4] ss:$0 sm:$0xff] }
 0x171   :  { %2850 = vmatprep.subr.bf16.mxu0 %v3988_v29 }
 0x173   :  { %2605 = vmatpush1.bf16.msra.mxu1 %v3983_v30 }
 0x174   :  { %2851 = vmatpush1.bf16.msra.mxu0 %v3986_v31  ;;  %2606 = vmatprep.subr.bf16.mxu1 %v3991_v32 }
 0x175   :  { %2852 = vmatprep.subr.bf16.mxu0 %v3994_v33 }
 0x177   :  { %2607 = vmatpush1.bf16.msra.mxu1 %v3989_v34 }
 0x178   :  { %2853 = vmatpush1.bf16.msra.mxu0 %v3992_v35  ;;  %2608 = vmatprep.subr.bf16.mxu1 %v3997_v36 }
 0x179   :  { %2854 = vmatprep.subr.bf16.mxu0 %v4000_v37 }
 0x17b   :  { %2609 = vmatpush1.bf16.msra.mxu1 %v3995_v38 }
 0x17c   :  { %2855 = vmatpush1.bf16.msra.mxu0 %v3998_v39  ;;  %2610 = vmatprep.subr.bf16.mxu1 %v4003_v40 }
 0x17d   :  { %2856 = vmatprep.subr.bf16.mxu0 %v4006_v41 }
 0x17f   :  { %2611 = vmatpush1.bf16.msra.mxu1 %v4001_v42 }
 0x180   :  { %2857 = vmatpush1.bf16.msra.mxu0 %v4004_v43  ;;  %3359 = vmatprep.subr.bf16.mxu1 %v4007_v51 }
 0x182   :  { %2613 = vmatmul.mubr.bf16.vlgmr.msra.gmra.mrb[0].mxu1 %v55_v48 }
 0x183   :  { %2859 = vmatmul.mubr.bf16.vlgmr.msra.gmra.mrb[0].mxu0 %v67_v49  ;;  %3361 = vmatpush1.bf16.msra.mxu1 %v3360_v50 }
 0x184   :  { %3362 = vmatprep.subr.bf16.mxu1 %v4007_v51 }
 0x187   :  { %3364 = vmatpush1.bf16.msra.mxu1 %v3363_v54 }
 0x188   :  { %3365 = vmatprep.subr.bf16.mxu1 %v4007_v51 }
 0x18b   :  { %3367 = vmatpush1.bf16.msra.mxu1 %v3366_v57 }
 0x18c   :  { %3368 = vmatprep.subr.bf16.mxu1 %v4007_v51 }
 0x18f   :  { %3370 = vmatpush1.bf16.msra.mxu1 %v3369_v60 }
 0x190   :  { %3371 = vmatprep.subr.bf16.mxu1 %v4007_v51 }
 0x193   :  { %3373 = vmatpush1.bf16.msra.mxu1 %v3372_v63 }
 0x194   :  { %3374 = vmatprep.subr.bf16.mxu1 %v4007_v51 }
 0x197   :  { %3376 = vmatpush1.bf16.msra.mxu1 %v3375_v2 }
 0x198   :  { %3377 = vmatprep.subr.bf16.mxu1 %v4007_v51 }
 0x19b   :  { %3379 = vmatpush1.bf16.msra.mxu1 %v3378_v5 }
 0x19c   :  { %3380 = vmatprep.subr.bf16.mxu1 %v4007_v51 }
 0x19f   :  { %3382 = vmatpush1.bf16.msra.mxu1 %v3381_v8 }
 0x1a0   :  { %3383 = vmatprep.subr.bf16.mxu1 %v4007_v51 }
 0x1a3   :  { %3385 = vmatpush1.bf16.msra.mxu1 %v3384_v11 }
 0x255   :  { %v2614_v13 = vpop.f32.mrb[0].mxu1 }
 0x256   :  { %v2860_v14 = vpop.f32.mrb[0].mxu0  ;;  %v3386_v15 = vadd.f32 %v2614_v13, %v454_v12  ;;  %v2616_v16 = vpop.f32.mrb[1].mxu1 }
 0x257   :  { %v2862_v17 = vpop.f32.mrb[1].mxu0  ;;  %v3388_v18 = vadd.f32 %v2616_v16, %v454_v12  ;;  %v2618_v19 = vpop.f32.mrb[2].mxu1 }
 0x258   :  { %v2864_v20 = vpop.f32.mrb[2].mxu0  ;;  %v3387_v21 = vadd.f32 %v3386_v15, %v2860_v14  ;;  %v2619_v22 = vpop.f32.mrb[3].mxu1 }
 0x259   :  { %v2865_v23 = vpop.f32.mrb[3].mxu0  ;;  %v3389_v24 = vadd.f32 %v3388_v18, %v2862_v17 }
 0x25a   :  { %v2867_v26 = vmax.f32 %v3387_v21, 0.0 }
 0x25b   :  { %v2868_v25 = vmax.f32 %v3389_v24, 0.0 }
 0x25d   :  { %3358 = vmatprep.mubr.msk.f32.mxu1 %vm2894_vm0, %v2868_v25 }
 0x25e   :  { %2963 = vmatmul.mubr.f32.vlgmr.msra.gmra.mrb[4].mxu1 %v2867_v26 }
 0x331   :  { %v2964_v28 = vpop.f32.mrb[4].mxu1 }
 0x332   :  { %v2965_v29 = vadd.f32 %v3357_v27, %v2964_v28  ;;  %v2966_v30 = vpop.f32.mrb[5].mxu1 }
 0x334   :  { %2968 = vst [vmem:[%s5330_s5] sm:$0xff] %v2965_v29 }

</bundles_post_ra>
